<compile_context>
chip_gen: v6e
topology: v6e:2x2x1
jax: 0.10.0
libtpu: 0.0.40
codegen_flags: <defaults>
</compile_context>

<pallas_src>
import jax
import jax.numpy as jnp
import numpy as np
from jax import lax
from jax.experimental import pallas as pl
from jax.experimental.pallas import tpu as pltpu


# ----------------------------- Pallas kernel -------------------------------- #
def tgcn_kernel(x_ref, lt_ref, wx_ref, bias_ref, lap_ref, w1h_ref, wch_ref,
                wout_ref, bout_ref, out_ref, xg_ref):
    N = lap_ref.shape[0]                      # num_nodes
    BH = wch_ref.shape[0]                     # batch * hidden
    T = x_ref.shape[0] // N                   # seq_len

    # ---- x-dependent work: two matmuls, off the serial h-chain -------------
    # xw[t*N + n, :] = x[b, t, n, :] @ Wx  (batch-block-diag, cols = [r|u|c])
    xw = jnp.dot(x_ref[...], wx_ref[...], preferred_element_type=jnp.float32)
    # xg[t-block] = L @ xw[t-block] + bias   (bias added AFTER L: matches ref)
    xg_ref[...] = (jnp.dot(lt_ref[...], xw, preferred_element_type=jnp.float32)
                   + bias_ref[...])

    lap = lap_ref[...]                        # (N, N)      raw Laplacian
    w1h = w1h_ref[...]                        # (B*H, 2*B*H)
    wch = wch_ref[...]                        # (B*H, B*H)

    # ---- GRU recurrence: only h-dependent work on the serial chain ---------
    def step(t, h):                           # h: (N, B*H)
        xg = xg_ref[pl.ds(t * N, N), :]       # (N, 3*B*H)
        ah = jnp.dot(lap, h, preferred_element_type=jnp.float32)         # (N, B*H)
        ru = jax.nn.sigmoid(
            xg[:, :2 * BH]
            + jnp.dot(ah, w1h, preferred_element_type=jnp.float32))      # (N, 2*B*H)
        r = ru[:, :BH]
        u = ru[:, BH:]
        arh = jnp.dot(lap, r * h, preferred_element_type=jnp.float32)    # (N, B*H)
        c = jnp.tanh(
            xg[:, 2 * BH:]
            + jnp.dot(arh, wch, preferred_element_type=jnp.float32))     # (N, B*H)
        return u * h + (1.0 - u) * c

    h0 = jnp.zeros((N, BH), jnp.float32)
    h_final = lax.fori_loop(0, T, step, h0, unroll=True)

    # ---- node mean folded into output projection ----------------------------
    hw = jnp.dot(h_final, wout_ref[...], preferred_element_type=jnp.float32)  # (N, B*OUT)
    out_ref[...] = (jnp.sum(hw, axis=0, keepdims=True) * (1.0 / N)
                    + bout_ref[...])                                          # (1, B*OUT)


# ------------------------------ host wrapper --------------------------------- #
def make_tgcn_forward(laplacian, W1, b1, W2, b2, W_out, b_out, *,
                      batch_size, seq_len):
    """Build the forward fn.  All parameter-only prep (krons / concats / bias
    tiling) is done ONCE here; the returned jitted fn only reshapes x per call.
    W_out is (hidden, 6): transpose torch's nn.Linear.weight when loading a
    real checkpoint."""
    N = laplacian.shape[0]
    H = W2.shape[1]
    C = W1.shape[0] - H
    OUT = W_out.shape[1]
    B, T = batch_size, seq_len
    BH = B * H
    f32 = jnp.float32

    eye_b = jnp.eye(B, dtype=f32)
    # Batch-block-diagonal weights; output columns ordered [r_b0..r_bB | u_... | c_...]
    wx_big = jnp.concatenate([jnp.kron(eye_b, W1[:C, :H]),
                              jnp.kron(eye_b, W1[:C, H:]),
                              jnp.kron(eye_b, W2[:C, :])], axis=1)        # (B*C, 3*B*H)
    w1h_big = jnp.concatenate([jnp.kron(eye_b, W1[C:, :H]),
                               jnp.kron(eye_b, W1[C:, H:])], axis=1)      # (B*H, 2*B*H)
    wch_big = jnp.kron(eye_b, W2[C:, :])                                  # (B*H, B*H)
    bias_big = jnp.concatenate([jnp.tile(b1[:H], B), jnp.tile(b1[H:], B),
                                jnp.tile(b2, B)]).reshape(1, 3 * BH)      # (1, 3*B*H)
    lt_big = jnp.kron(jnp.eye(T, dtype=f32), laplacian.astype(f32))       # (T*N, T*N)
    wout_big = jnp.kron(eye_b, W_out)                                     # (B*H, B*OUT)
    bout_big = jnp.tile(b_out, B).reshape(1, B * OUT)
    lap_f32 = laplacian.astype(f32)

    vmem = pl.BlockSpec(memory_space=pltpu.MemorySpace.VMEM)
    call = pl.pallas_call(
        tgcn_kernel,
        out_shape=jax.ShapeDtypeStruct((1, B * OUT), f32),
        in_specs=[vmem] * 9,
        out_specs=vmem,
        scratch_shapes=[pltpu.VMEM((T * N, 3 * BH), f32)],   # x-side pre-activations
    )

    @jax.jit
    def forward(x):
        # (B, T, N, C) -> (T*N, B*C): the only genuinely per-call host prep.
        x_arr = jnp.transpose(x.astype(f32), (1, 2, 0, 3)).reshape(T * N, B * C)
        out = call(x_arr, lt_big, wx_big, bias_big, lap_f32,
                   w1h_big, wch_big, wout_big, bout_big)
        return out.reshape(B, OUT)            # cols are [batch0(6) | batch1(6)]

    return forward


# --------------------------- plain-JAX reference ----------------------------- #
def tgcn_global_output_ref(x, laplacian, W1, b1, W2, b2, W_out, b_out):
    B, seq_len, N, C = x.shape
    H = W2.shape[1]
    with jax.default_matmul_precision("float32"):
        h = jnp.zeros((B, N, H), jnp.float32)
        for t in range(seq_len):
            x_t = x[:, t]
            cat = jnp.concatenate([x_t, h], axis=-1)
            a = jnp.einsum('nm,bmk->bnk', laplacian, cat)
            ru = jax.nn.sigmoid(a @ W1 + b1)
            r, u = ru[..., :H], ru[..., H:]
            cat2 = jnp.concatenate([x_t, r * h], axis=-1)
            a2 = jnp.einsum('nm,bmk->bnk', laplacian, cat2)
            c = jnp.tanh(a2 @ W2 + b2)
            h = u * h + (1.0 - u) * c
        agg = h.mean(axis=1)
        return agg @ W_out + b_out


# ------------------------------ param / adj setup ---------------------------- #
def calculate_laplacian_with_self_loop(adj):
    A = adj + jnp.eye(adj.shape[0], dtype=adj.dtype)
    d = A.sum(axis=1)
    d_inv_sqrt = jnp.power(d, -0.5)
    d_inv_sqrt = jnp.where(jnp.isinf(d_inv_sqrt), 0.0, d_inv_sqrt)
    return (A * d_inv_sqrt[:, None]) * d_inv_sqrt[None, :]


def xavier_uniform(key, shape):
    fan_in, fan_out = shape
    bound = float(np.sqrt(6.0 / (fan_in + fan_out)))
    return jax.random.uniform(key, shape, jnp.float32, -bound, bound)


if __name__ == "__main__":
    B, seq_len, N, C, H, OUT = 2, 8, 16, 4, 32, 6

    key = jax.random.PRNGKey(0)
    k_adj, k_x, k_w1, k_w2, k_wo, k_bo = jax.random.split(key, 6)

    # deterministic synthetic adjacency (nonnegative, symmetric)
    adj = jax.random.uniform(k_adj, (N, N), jnp.float32)
    adj = 0.5 * (adj + adj.T)
    laplacian = calculate_laplacian_with_self_loop(adj)

    # parameters (shapes per the module __init__)
    W1 = xavier_uniform(k_w1, (C + H, 2 * H))      # graph_conv1.weights
    b1 = jnp.full((2 * H,), 1.0, jnp.float32)      # graph_conv1.biases (bias=1.0)
    W2 = xavier_uniform(k_w2, (C + H, H))          # graph_conv2.weights
    b2 = jnp.zeros((H,), jnp.float32)              # graph_conv2.biases (bias=0.0)
    W_out = xavier_uniform(k_wo, (H, OUT))         # output_layer weight as (in, out)
    b_out = jax.random.uniform(k_bo, (OUT,), jnp.float32, -0.1, 0.1)

    x = jax.random.normal(k_x, (B, seq_len, N, C), jnp.float32)

    forward = make_tgcn_forward(laplacian, W1, b1, W2, b2, W_out, b_out,
                                batch_size=B, seq_len=seq_len)
    out = jax.block_until_ready(forward(x))

    ref = tgcn_global_output_ref(x, laplacian, W1, b1, W2, b2, W_out, b_out)
    # Tolerance allows for MXU multi-pass f32 matmul differences between the
    # Pallas kernel and the XLA reference over the 8 recurrent steps.
    np.testing.assert_allclose(np.asarray(out), np.asarray(ref),
                               rtol=5e-3, atol=5e-3)

    print("KERNEL_OK")
</pallas_src>

<mosaic_0001>
module attributes {stable_mosaic.version = 11 : i64} {
  func.func @tgcn_kernel(%arg0: memref<128x8xf32, #tpu.memory_space<vmem>>, %arg1: memref<128x128xf32, #tpu.memory_space<vmem>>, %arg2: memref<8x192xf32, #tpu.memory_space<vmem>>, %arg3: memref<1x192xf32, #tpu.memory_space<vmem>>, %arg4: memref<16x16xf32, #tpu.memory_space<vmem>>, %arg5: memref<64x128xf32, #tpu.memory_space<vmem>>, %arg6: memref<64x64xf32, #tpu.memory_space<vmem>>, %arg7: memref<64x12xf32, #tpu.memory_space<vmem>>, %arg8: memref<1x12xf32, #tpu.memory_space<vmem>>, %arg9: memref<1x12xf32, #tpu.memory_space<vmem>>, %arg10: memref<128x192xf32, #tpu.memory_space<vmem>>) attributes {dimension_semantics = [], scalar_prefetch = 0 : i64, scratch_operands = 1 : i64, tpu.core_type = #tpu.core_type<tc>} {
    %c0 = arith.constant 0 : index
    %c0_0 = arith.constant 0 : index
    %0 = vector.load %arg0[%c0, %c0_0] : memref<128x8xf32, #tpu.memory_space<vmem>>, vector<128x8xf32>
    %c0_1 = arith.constant 0 : index
    %c0_2 = arith.constant 0 : index
    %1 = vector.load %arg2[%c0_1, %c0_2] : memref<8x192xf32, #tpu.memory_space<vmem>>, vector<8x192xf32>
    %cst = arith.constant dense<0.000000e+00> : vector<128x192xf32>
    %2 = tpu.matmul %0, %1, %cst {dimension_numbers = #tpu.dot_dimension_numbers<[1], [0], [0], [1], [0, 0, 1, 1], [], []>} : vector<128x8xf32>, vector<8x192xf32>, vector<128x192xf32> -> vector<128x192xf32>
    %c0_3 = arith.constant 0 : index
    %c0_4 = arith.constant 0 : index
    %3 = vector.load %arg1[%c0_3, %c0_4] : memref<128x128xf32, #tpu.memory_space<vmem>>, vector<128x128xf32>
    %cst_5 = arith.constant dense<0.000000e+00> : vector<128x192xf32>
    %4 = tpu.matmul %3, %2, %cst_5 {dimension_numbers = #tpu.dot_dimension_numbers<[1], [0], [0], [1], [0, 0, 1, 1], [], []>} : vector<128x128xf32>, vector<128x192xf32>, vector<128x192xf32> -> vector<128x192xf32>
    %c0_6 = arith.constant 0 : index
    %c0_7 = arith.constant 0 : index
    %5 = vector.load %arg3[%c0_6, %c0_7] : memref<1x192xf32, #tpu.memory_space<vmem>>, vector<1x192xf32>
    %6 = vector.broadcast %5 : vector<1x192xf32> to vector<128x192xf32>
    %7 = arith.addf %4, %6 : vector<128x192xf32>
    %c0_8 = arith.constant 0 : index
    %c0_9 = arith.constant 0 : index
    %8 = vector.load %arg10[%c0_8, %c0_9] : memref<128x192xf32, #tpu.memory_space<vmem>>, vector<128x192xf32>
    tpu.vector_store %arg10[%c0_8, %c0_9], %7 {strides = array<i32>} : memref<128x192xf32, #tpu.memory_space<vmem>>, vector<128x192xf32>,
    %c0_10 = arith.constant 0 : index
    %c0_11 = arith.constant 0 : index
    %9 = vector.load %arg4[%c0_10, %c0_11] : memref<16x16xf32, #tpu.memory_space<vmem>>, vector<16x16xf32>
    %c0_12 = arith.constant 0 : index
    %c0_13 = arith.constant 0 : index
    %10 = vector.load %arg5[%c0_12, %c0_13] : memref<64x128xf32, #tpu.memory_space<vmem>>, vector<64x128xf32>
    %c0_14 = arith.constant 0 : index
    %c0_15 = arith.constant 0 : index
    %11 = vector.load %arg6[%c0_14, %c0_15] : memref<64x64xf32, #tpu.memory_space<vmem>>, vector<64x64xf32>
    %cst_16 = arith.constant 0.000000e+00 : f32
    %12 = vector.broadcast %cst_16 : f32 to vector<16x64xf32>
    %c0_i32 = arith.constant 0 : i32
    %c16_i32 = arith.constant 16 : i32
    %13 = arith.muli %c0_i32, %c16_i32 : i32
    %14 = arith.index_cast %13 : i32 to index
    %c0_17 = arith.constant 0 : index
    %15 = vector.load %arg10[%14, %c0_17] : memref<128x192xf32, #tpu.memory_space<vmem>>, vector<16x192xf32>
    %cst_18 = arith.constant dense<0.000000e+00> : vector<16x64xf32>
    %16 = tpu.matmul %9, %12, %cst_18 {dimension_numbers = #tpu.dot_dimension_numbers<[1], [0], [0], [1], [0, 0, 1, 1], [], []>} : vector<16x16xf32>, vector<16x64xf32>, vector<16x64xf32> -> vector<16x64xf32>
    %17 = vector.extract_strided_slice %15 {offsets = [0, 0], sizes = [16, 128], strides = [1, 1]} : vector<16x192xf32> to vector<16x128xf32>
    %cst_19 = arith.constant dense<0.000000e+00> : vector<16x128xf32>
    %18 = tpu.matmul %16, %10, %cst_19 {dimension_numbers = #tpu.dot_dimension_numbers<[1], [0], [0], [1], [0, 0, 1, 1], [], []>} : vector<16x64xf32>, vector<64x128xf32>, vector<16x128xf32> -> vector<16x128xf32>
    %19 = arith.addf %17, %18 : vector<16x128xf32>
    %20 = arith.negf %19 : vector<16x128xf32>
    %21 = math.exp %20 : vector<16x128xf32>
    %cst_20 = arith.constant 1.000000e+00 : f32
    %22 = vector.broadcast %cst_20 : f32 to vector<16x128xf32>
    %23 = arith.addf %22, %21 : vector<16x128xf32>
    %24 = arith.divf %22, %23 : vector<16x128xf32>
    %25 = vector.extract_strided_slice %24 {offsets = [0, 0], sizes = [16, 64], strides = [1, 1]} : vector<16x128xf32> to vector<16x64xf32>
    %26 = vector.extract_strided_slice %24 {offsets = [0, 64], sizes = [16, 64], strides = [1, 1]} : vector<16x128xf32> to vector<16x64xf32>
    %27 = arith.mulf %25, %12 : vector<16x64xf32>
    %cst_21 = arith.constant dense<0.000000e+00> : vector<16x64xf32>
    %28 = tpu.matmul %9, %27, %cst_21 {dimension_numbers = #tpu.dot_dimension_numbers<[1], [0], [0], [1], [0, 0, 1, 1], [], []>} : vector<16x16xf32>, vector<16x64xf32>, vector<16x64xf32> -> vector<16x64xf32>
    %29 = vector.extract_strided_slice %15 {offsets = [0, 128], sizes = [16, 64], strides = [1, 1]} : vector<16x192xf32> to vector<16x64xf32>
    %cst_22 = arith.constant dense<0.000000e+00> : vector<16x64xf32>
    %30 = tpu.matmul %28, %11, %cst_22 {dimension_numbers = #tpu.dot_dimension_numbers<[1], [0], [0], [1], [0, 0, 1, 1], [], []>} : vector<16x64xf32>, vector<64x64xf32>, vector<16x64xf32> -> vector<16x64xf32>
    %31 = arith.addf %29, %30 : vector<16x64xf32>
    %32 = math.tanh %31 : vector<16x64xf32>
    %33 = arith.mulf %26, %12 : vector<16x64xf32>
    %cst_23 = arith.constant 1.000000e+00 : f32
    %34 = vector.broadcast %cst_23 : f32 to vector<16x64xf32>
    %35 = arith.subf %34, %26 : vector<16x64xf32>
    %36 = arith.mulf %35, %32 : vector<16x64xf32>
    %37 = arith.addf %33, %36 : vector<16x64xf32>
    %c1_i32 = arith.constant 1 : i32
    %c16_i32_24 = arith.constant 16 : i32
    %38 = arith.muli %c1_i32, %c16_i32_24 : i32
    %39 = arith.index_cast %38 : i32 to index
    %c0_25 = arith.constant 0 : index
    %40 = vector.load %arg10[%39, %c0_25] : memref<128x192xf32, #tpu.memory_space<vmem>>, vector<16x192xf32>
    %cst_26 = arith.constant dense<0.000000e+00> : vector<16x64xf32>
    %41 = tpu.matmul %9, %37, %cst_26 {dimension_numbers = #tpu.dot_dimension_numbers<[1], [0], [0], [1], [0, 0, 1, 1], [], []>} : vector<16x16xf32>, vector<16x64xf32>, vector<16x64xf32> -> vector<16x64xf32>
    %42 = vector.extract_strided_slice %40 {offsets = [0, 0], sizes = [16, 128], strides = [1, 1]} : vector<16x192xf32> to vector<16x128xf32>
    %cst_27 = arith.constant dense<0.000000e+00> : vector<16x128xf32>
    %43 = tpu.matmul %41, %10, %cst_27 {dimension_numbers = #tpu.dot_dimension_numbers<[1], [0], [0], [1], [0, 0, 1, 1], [], []>} : vector<16x64xf32>, vector<64x128xf32>, vector<16x128xf32> -> vector<16x128xf32>
    %44 = arith.addf %42, %43 : vector<16x128xf32>
    %45 = arith.negf %44 : vector<16x128xf32>
    %46 = math.exp %45 : vector<16x128xf32>
    %cst_28 = arith.constant 1.000000e+00 : f32
    %47 = vector.broadcast %cst_28 : f32 to vector<16x128xf32>
    %48 = arith.addf %47, %46 : vector<16x128xf32>
    %49 = arith.divf %47, %48 : vector<16x128xf32>
    %50 = vector.extract_strided_slice %49 {offsets = [0, 0], sizes = [16, 64], strides = [1, 1]} : vector<16x128xf32> to vector<16x64xf32>
    %51 = vector.extract_strided_slice %49 {offsets = [0, 64], sizes = [16, 64], strides = [1, 1]} : vector<16x128xf32> to vector<16x64xf32>
    %52 = arith.mulf %50, %37 : vector<16x64xf32>
    %cst_29 = arith.constant dense<0.000000e+00> : vector<16x64xf32>
    %53 = tpu.matmul %9, %52, %cst_29 {dimension_numbers = #tpu.dot_dimension_numbers<[1], [0], [0], [1], [0, 0, 1, 1], [], []>} : vector<16x16xf32>, vector<16x64xf32>, vector<16x64xf32> -> vector<16x64xf32>
    %54 = vector.extract_strided_slice %40 {offsets = [0, 128], sizes = [16, 64], strides = [1, 1]} : vector<16x192xf32> to vector<16x64xf32>
    %cst_30 = arith.constant dense<0.000000e+00> : vector<16x64xf32>
    %55 = tpu.matmul %53, %11, %cst_30 {dimension_numbers = #tpu.dot_dimension_numbers<[1], [0], [0], [1], [0, 0, 1, 1], [], []>} : vector<16x64xf32>, vector<64x64xf32>, vector<16x64xf32> -> vector<16x64xf32>
    %56 = arith.addf %54, %55 : vector<16x64xf32>
    %57 = math.tanh %56 : vector<16x64xf32>
    %58 = arith.mulf %51, %37 : vector<16x64xf32>
    %cst_31 = arith.constant 1.000000e+00 : f32
    %59 = vector.broadcast %cst_31 : f32 to vector<16x64xf32>
    %60 = arith.subf %59, %51 : vector<16x64xf32>
    %61 = arith.mulf %60, %57 : vector<16x64xf32>
    %62 = arith.addf %58, %61 : vector<16x64xf32>
    %c2_i32 = arith.constant 2 : i32
    %c16_i32_32 = arith.constant 16 : i32
    %63 = arith.muli %c2_i32, %c16_i32_32 : i32
    %64 = arith.index_cast %63 : i32 to index
    %c0_33 = arith.constant 0 : index
    %65 = vector.load %arg10[%64, %c0_33] : memref<128x192xf32, #tpu.memory_space<vmem>>, vector<16x192xf32>
    %cst_34 = arith.constant dense<0.000000e+00> : vector<16x64xf32>
    %66 = tpu.matmul %9, %62, %cst_34 {dimension_numbers = #tpu.dot_dimension_numbers<[1], [0], [0], [1], [0, 0, 1, 1], [], []>} : vector<16x16xf32>, vector<16x64xf32>, vector<16x64xf32> -> vector<16x64xf32>
    %67 = vector.extract_strided_slice %65 {offsets = [0, 0], sizes = [16, 128], strides = [1, 1]} : vector<16x192xf32> to vector<16x128xf32>
    %cst_35 = arith.constant dense<0.000000e+00> : vector<16x128xf32>
    %68 = tpu.matmul %66, %10, %cst_35 {dimension_numbers = #tpu.dot_dimension_numbers<[1], [0], [0], [1], [0, 0, 1, 1], [], []>} : vector<16x64xf32>, vector<64x128xf32>, vector<16x128xf32> -> vector<16x128xf32>
    %69 = arith.addf %67, %68 : vector<16x128xf32>
    %70 = arith.negf %69 : vector<16x128xf32>
    %71 = math.exp %70 : vector<16x128xf32>
    %cst_36 = arith.constant 1.000000e+00 : f32
    %72 = vector.broadcast %cst_36 : f32 to vector<16x128xf32>
    %73 = arith.addf %72, %71 : vector<16x128xf32>
    %74 = arith.divf %72, %73 : vector<16x128xf32>
    %75 = vector.extract_strided_slice %74 {offsets = [0, 0], sizes = [16, 64], strides = [1, 1]} : vector<16x128xf32> to vector<16x64xf32>
    %76 = vector.extract_strided_slice %74 {offsets = [0, 64], sizes = [16, 64], strides = [1, 1]} : vector<16x128xf32> to vector<16x64xf32>
    %77 = arith.mulf %75, %62 : vector<16x64xf32>
    %cst_37 = arith.constant dense<0.000000e+00> : vector<16x64xf32>
    %78 = tpu.matmul %9, %77, %cst_37 {dimension_numbers = #tpu.dot_dimension_numbers<[1], [0], [0], [1], [0, 0, 1, 1], [], []>} : vector<16x16xf32>, vector<16x64xf32>, vector<16x64xf32> -> vector<16x64xf32>
    %79 = vector.extract_strided_slice %65 {offsets = [0, 128], sizes = [16, 64], strides = [1, 1]} : vector<16x192xf32> to vector<16x64xf32>
    %cst_38 = arith.constant dense<0.000000e+00> : vector<16x64xf32>
    %80 = tpu.matmul %78, %11, %cst_38 {dimension_numbers = #tpu.dot_dimension_numbers<[1], [0], [0], [1], [0, 0, 1, 1], [], []>} : vector<16x64xf32>, vector<64x64xf32>, vector<16x64xf32> -> vector<16x64xf32>
    %81 = arith.addf %79, %80 : vector<16x64xf32>
    %82 = math.tanh %81 : vector<16x64xf32>
    %83 = arith.mulf %76, %62 : vector<16x64xf32>
    %cst_39 = arith.constant 1.000000e+00 : f32
    %84 = vector.broadcast %cst_39 : f32 to vector<16x64xf32>
    %85 = arith.subf %84, %76 : vector<16x64xf32>
    %86 = arith.mulf %85, %82 : vector<16x64xf32>
    %87 = arith.addf %83, %86 : vector<16x64xf32>
    %c3_i32 = arith.constant 3 : i32
    %c16_i32_40 = arith.constant 16 : i32
    %88 = arith.muli %c3_i32, %c16_i32_40 : i32
    %89 = arith.index_cast %88 : i32 to index
    %c0_41 = arith.constant 0 : index
    %90 = vector.load %arg10[%89, %c0_41] : memref<128x192xf32, #tpu.memory_space<vmem>>, vector<16x192xf32>
    %cst_42 = arith.constant dense<0.000000e+00> : vector<16x64xf32>
    %91 = tpu.matmul %9, %87, %cst_42 {dimension_numbers = #tpu.dot_dimension_numbers<[1], [0], [0], [1], [0, 0, 1, 1], [], []>} : vector<16x16xf32>, vector<16x64xf32>, vector<16x64xf32> -> vector<16x64xf32>
    %92 = vector.extract_strided_slice %90 {offsets = [0, 0], sizes = [16, 128], strides = [1, 1]} : vector<16x192xf32> to vector<16x128xf32>
    %cst_43 = arith.constant dense<0.000000e+00> : vector<16x128xf32>
    %93 = tpu.matmul %91, %10, %cst_43 {dimension_numbers = #tpu.dot_dimension_numbers<[1], [0], [0], [1], [0, 0, 1, 1], [], []>} : vector<16x64xf32>, vector<64x128xf32>, vector<16x128xf32> -> vector<16x128xf32>
    %94 = arith.addf %92, %93 : vector<16x128xf32>
    %95 = arith.negf %94 : vector<16x128xf32>
    %96 = math.exp %95 : vector<16x128xf32>
    %cst_44 = arith.constant 1.000000e+00 : f32
    %97 = vector.broadcast %cst_44 : f32 to vector<16x128xf32>
    %98 = arith.addf %97, %96 : vector<16x128xf32>
    %99 = arith.divf %97, %98 : vector<16x128xf32>
    %100 = vector.extract_strided_slice %99 {offsets = [0, 0], sizes = [16, 64], strides = [1, 1]} : vector<16x128xf32> to vector<16x64xf32>
    %101 = vector.extract_strided_slice %99 {offsets = [0, 64], sizes = [16, 64], strides = [1, 1]} : vector<16x128xf32> to vector<16x64xf32>
    %102 = arith.mulf %100, %87 : vector<16x64xf32>
    %cst_45 = arith.constant dense<0.000000e+00> : vector<16x64xf32>
    %103 = tpu.matmul %9, %102, %cst_45 {dimension_numbers = #tpu.dot_dimension_numbers<[1], [0], [0], [1], [0, 0, 1, 1], [], []>} : vector<16x16xf32>, vector<16x64xf32>, vector<16x64xf32> -> vector<16x64xf32>
    %104 = vector.extract_strided_slice %90 {offsets = [0, 128], sizes = [16, 64], strides = [1, 1]} : vector<16x192xf32> to vector<16x64xf32>
    %cst_46 = arith.constant dense<0.000000e+00> : vector<16x64xf32>
    %105 = tpu.matmul %103, %11, %cst_46 {dimension_numbers = #tpu.dot_dimension_numbers<[1], [0], [0], [1], [0, 0, 1, 1], [], []>} : vector<16x64xf32>, vector<64x64xf32>, vector<16x64xf32> -> vector<16x64xf32>
    %106 = arith.addf %104, %105 : vector<16x64xf32>
    %107 = math.tanh %106 : vector<16x64xf32>
    %108 = arith.mulf %101, %87 : vector<16x64xf32>
    %cst_47 = arith.constant 1.000000e+00 : f32
    %109 = vector.broadcast %cst_47 : f32 to vector<16x64xf32>
    %110 = arith.subf %109, %101 : vector<16x64xf32>
    %111 = arith.mulf %110, %107 : vector<16x64xf32>
    %112 = arith.addf %108, %111 : vector<16x64xf32>
    %c4_i32 = arith.constant 4 : i32
    %c16_i32_48 = arith.constant 16 : i32
    %113 = arith.muli %c4_i32, %c16_i32_48 : i32
    %114 = arith.index_cast %113 : i32 to index
    %c0_49 = arith.constant 0 : index
    %115 = vector.load %arg10[%114, %c0_49] : memref<128x192xf32, #tpu.memory_space<vmem>>, vector<16x192xf32>
    %cst_50 = arith.constant dense<0.000000e+00> : vector<16x64xf32>
    %116 = tpu.matmul %9, %112, %cst_50 {dimension_numbers = #tpu.dot_dimension_numbers<[1], [0], [0], [1], [0, 0, 1, 1], [], []>} : vector<16x16xf32>, vector<16x64xf32>, vector<16x64xf32> -> vector<16x64xf32>
    %117 = vector.extract_strided_slice %115 {offsets = [0, 0], sizes = [16, 128], strides = [1, 1]} : vector<16x192xf32> to vector<16x128xf32>
    %cst_51 = arith.constant dense<0.000000e+00> : vector<16x128xf32>
    %118 = tpu.matmul %116, %10, %cst_51 {dimension_numbers = #tpu.dot_dimension_numbers<[1], [0], [0], [1], [0, 0, 1, 1], [], []>} : vector<16x64xf32>, vector<64x128xf32>, vector<16x128xf32> -> vector<16x128xf32>
    %119 = arith.addf %117, %118 : vector<16x128xf32>
    %120 = arith.negf %119 : vector<16x128xf32>
    %121 = math.exp %120 : vector<16x128xf32>
    %cst_52 = arith.constant 1.000000e+00 : f32
    %122 = vector.broadcast %cst_52 : f32 to vector<16x128xf32>
    %123 = arith.addf %122, %121 : vector<16x128xf32>
    %124 = arith.divf %122, %123 : vector<16x128xf32>
    %125 = vector.extract_strided_slice %124 {offsets = [0, 0], sizes = [16, 64], strides = [1, 1]} : vector<16x128xf32> to vector<16x64xf32>
    %126 = vector.extract_strided_slice %124 {offsets = [0, 64], sizes = [16, 64], strides = [1, 1]} : vector<16x128xf32> to vector<16x64xf32>
    %127 = arith.mulf %125, %112 : vector<16x64xf32>
    %cst_53 = arith.constant dense<0.000000e+00> : vector<16x64xf32>
    %128 = tpu.matmul %9, %127, %cst_53 {dimension_numbers = #tpu.dot_dimension_numbers<[1], [0], [0], [1], [0, 0, 1, 1], [], []>} : vector<16x16xf32>, vector<16x64xf32>, vector<16x64xf32> -> vector<16x64xf32>
    %129 = vector.extract_strided_slice %115 {offsets = [0, 128], sizes = [16, 64], strides = [1, 1]} : vector<16x192xf32> to vector<16x64xf32>
    %cst_54 = arith.constant dense<0.000000e+00> : vector<16x64xf32>
    %130 = tpu.matmul %128, %11, %cst_54 {dimension_numbers = #tpu.dot_dimension_numbers<[1], [0], [0], [1], [0, 0, 1, 1], [], []>} : vector<16x64xf32>, vector<64x64xf32>, vector<16x64xf32> -> vector<16x64xf32>
    %131 = arith.addf %129, %130 : vector<16x64xf32>
    %132 = math.tanh %131 : vector<16x64xf32>
    %133 = arith.mulf %126, %112 : vector<16x64xf32>
    %cst_55 = arith.constant 1.000000e+00 : f32
    %134 = vector.broadcast %cst_55 : f32 to vector<16x64xf32>
    %135 = arith.subf %134, %126 : vector<16x64xf32>
    %136 = arith.mulf %135, %132 : vector<16x64xf32>
    %137 = arith.addf %133, %136 : vector<16x64xf32>
    %c5_i32 = arith.constant 5 : i32
    %c16_i32_56 = arith.constant 16 : i32
    %138 = arith.muli %c5_i32, %c16_i32_56 : i32
    %139 = arith.index_cast %138 : i32 to index
    %c0_57 = arith.constant 0 : index
    %140 = vector.load %arg10[%139, %c0_57] : memref<128x192xf32, #tpu.memory_space<vmem>>, vector<16x192xf32>
    %cst_58 = arith.constant dense<0.000000e+00> : vector<16x64xf32>
    %141 = tpu.matmul %9, %137, %cst_58 {dimension_numbers = #tpu.dot_dimension_numbers<[1], [0], [0], [1], [0, 0, 1, 1], [], []>} : vector<16x16xf32>, vector<16x64xf32>, vector<16x64xf32> -> vector<16x64xf32>
    %142 = vector.extract_strided_slice %140 {offsets = [0, 0], sizes = [16, 128], strides = [1, 1]} : vector<16x192xf32> to vector<16x128xf32>
    %cst_59 = arith.constant dense<0.000000e+00> : vector<16x128xf32>
    %143 = tpu.matmul %141, %10, %cst_59 {dimension_numbers = #tpu.dot_dimension_numbers<[1], [0], [0], [1], [0, 0, 1, 1], [], []>} : vector<16x64xf32>, vector<64x128xf32>, vector<16x128xf32> -> vector<16x128xf32>
    %144 = arith.addf %142, %143 : vector<16x128xf32>
    %145 = arith.negf %144 : vector<16x128xf32>
    %146 = math.exp %145 : vector<16x128xf32>
    %cst_60 = arith.constant 1.000000e+00 : f32
    %147 = vector.broadcast %cst_60 : f32 to vector<16x128xf32>
    %148 = arith.addf %147, %146 : vector<16x128xf32>
    %149 = arith.divf %147, %148 : vector<16x128xf32>
    %150 = vector.extract_strided_slice %149 {offsets = [0, 0], sizes = [16, 64], strides = [1, 1]} : vector<16x128xf32> to vector<16x64xf32>
    %151 = vector.extract_strided_slice %149 {offsets = [0, 64], sizes = [16, 64], strides = [1, 1]} : vector<16x128xf32> to vector<16x64xf32>
    %152 = arith.mulf %150, %137 : vector<16x64xf32>
    %cst_61 = arith.constant dense<0.000000e+00> : vector<16x64xf32>
    %153 = tpu.matmul %9, %152, %cst_61 {dimension_numbers = #tpu.dot_dimension_numbers<[1], [0], [0], [1], [0, 0, 1, 1], [], []>} : vector<16x16xf32>, vector<16x64xf32>, vector<16x64xf32> -> vector<16x64xf32>
    %154 = vector.extract_strided_slice %140 {offsets = [0, 128], sizes = [16, 64], strides = [1, 1]} : vector<16x192xf32> to vector<16x64xf32>
    %cst_62 = arith.constant dense<0.000000e+00> : vector<16x64xf32>
    %155 = tpu.matmul %153, %11, %cst_62 {dimension_numbers = #tpu.dot_dimension_numbers<[1], [0], [0], [1], [0, 0, 1, 1], [], []>} : vector<16x64xf32>, vector<64x64xf32>, vector<16x64xf32> -> vector<16x64xf32>
    %156 = arith.addf %154, %155 : vector<16x64xf32>
    %157 = math.tanh %156 : vector<16x64xf32>
    %158 = arith.mulf %151, %137 : vector<16x64xf32>
    %cst_63 = arith.constant 1.000000e+00 : f32
    %159 = vector.broadcast %cst_63 : f32 to vector<16x64xf32>
    %160 = arith.subf %159, %151 : vector<16x64xf32>
    %161 = arith.mulf %160, %157 : vector<16x64xf32>
    %162 = arith.addf %158, %161 : vector<16x64xf32>
    %c6_i32 = arith.constant 6 : i32
    %c16_i32_64 = arith.constant 16 : i32
    %163 = arith.muli %c6_i32, %c16_i32_64 : i32
    %164 = arith.index_cast %163 : i32 to index
    %c0_65 = arith.constant 0 : index
    %165 = vector.load %arg10[%164, %c0_65] : memref<128x192xf32, #tpu.memory_space<vmem>>, vector<16x192xf32>
    %cst_66 = arith.constant dense<0.000000e+00> : vector<16x64xf32>
    %166 = tpu.matmul %9, %162, %cst_66 {dimension_numbers = #tpu.dot_dimension_numbers<[1], [0], [0], [1], [0, 0, 1, 1], [], []>} : vector<16x16xf32>, vector<16x64xf32>, vector<16x64xf32> -> vector<16x64xf32>
    %167 = vector.extract_strided_slice %165 {offsets = [0, 0], sizes = [16, 128], strides = [1, 1]} : vector<16x192xf32> to vector<16x128xf32>
    %cst_67 = arith.constant dense<0.000000e+00> : vector<16x128xf32>
    %168 = tpu.matmul %166, %10, %cst_67 {dimension_numbers = #tpu.dot_dimension_numbers<[1], [0], [0], [1], [0, 0, 1, 1], [], []>} : vector<16x64xf32>, vector<64x128xf32>, vector<16x128xf32> -> vector<16x128xf32>
    %169 = arith.addf %167, %168 : vector<16x128xf32>
    %170 = arith.negf %169 : vector<16x128xf32>
    %171 = math.exp %170 : vector<16x128xf32>
    %cst_68 = arith.constant 1.000000e+00 : f32
    %172 = vector.broadcast %cst_68 : f32 to vector<16x128xf32>
    %173 = arith.addf %172, %171 : vector<16x128xf32>
    %174 = arith.divf %172, %173 : vector<16x128xf32>
    %175 = vector.extract_strided_slice %174 {offsets = [0, 0], sizes = [16, 64], strides = [1, 1]} : vector<16x128xf32> to vector<16x64xf32>
    %176 = vector.extract_strided_slice %174 {offsets = [0, 64], sizes = [16, 64], strides = [1, 1]} : vector<16x128xf32> to vector<16x64xf32>
    %177 = arith.mulf %175, %162 : vector<16x64xf32>
    %cst_69 = arith.constant dense<0.000000e+00> : vector<16x64xf32>
    %178 = tpu.matmul %9, %177, %cst_69 {dimension_numbers = #tpu.dot_dimension_numbers<[1], [0], [0], [1], [0, 0, 1, 1], [], []>} : vector<16x16xf32>, vector<16x64xf32>, vector<16x64xf32> -> vector<16x64xf32>
    %179 = vector.extract_strided_slice %165 {offsets = [0, 128], sizes = [16, 64], strides = [1, 1]} : vector<16x192xf32> to vector<16x64xf32>
    %cst_70 = arith.constant dense<0.000000e+00> : vector<16x64xf32>
    %180 = tpu.matmul %178, %11, %cst_70 {dimension_numbers = #tpu.dot_dimension_numbers<[1], [0], [0], [1], [0, 0, 1, 1], [], []>} : vector<16x64xf32>, vector<64x64xf32>, vector<16x64xf32> -> vector<16x64xf32>
    %181 = arith.addf %179, %180 : vector<16x64xf32>
    %182 = math.tanh %181 : vector<16x64xf32>
    %183 = arith.mulf %176, %162 : vector<16x64xf32>
    %cst_71 = arith.constant 1.000000e+00 : f32
    %184 = vector.broadcast %cst_71 : f32 to vector<16x64xf32>
    %185 = arith.subf %184, %176 : vector<16x64xf32>
    %186 = arith.mulf %185, %182 : vector<16x64xf32>
    %187 = arith.addf %183, %186 : vector<16x64xf32>
    %c7_i32 = arith.constant 7 : i32
    %c16_i32_72 = arith.constant 16 : i32
    %188 = arith.muli %c7_i32, %c16_i32_72 : i32
    %189 = arith.index_cast %188 : i32 to index
    %c0_73 = arith.constant 0 : index
    %190 = vector.load %arg10[%189, %c0_73] : memref<128x192xf32, #tpu.memory_space<vmem>>, vector<16x192xf32>
    %cst_74 = arith.constant dense<0.000000e+00> : vector<16x64xf32>
    %191 = tpu.matmul %9, %187, %cst_74 {dimension_numbers = #tpu.dot_dimension_numbers<[1], [0], [0], [1], [0, 0, 1, 1], [], []>} : vector<16x16xf32>, vector<16x64xf32>, vector<16x64xf32> -> vector<16x64xf32>
    %192 = vector.extract_strided_slice %190 {offsets = [0, 0], sizes = [16, 128], strides = [1, 1]} : vector<16x192xf32> to vector<16x128xf32>
    %cst_75 = arith.constant dense<0.000000e+00> : vector<16x128xf32>
    %193 = tpu.matmul %191, %10, %cst_75 {dimension_numbers = #tpu.dot_dimension_numbers<[1], [0], [0], [1], [0, 0, 1, 1], [], []>} : vector<16x64xf32>, vector<64x128xf32>, vector<16x128xf32> -> vector<16x128xf32>
    %194 = arith.addf %192, %193 : vector<16x128xf32>
    %195 = arith.negf %194 : vector<16x128xf32>
    %196 = math.exp %195 : vector<16x128xf32>
    %cst_76 = arith.constant 1.000000e+00 : f32
    %197 = vector.broadcast %cst_76 : f32 to vector<16x128xf32>
    %198 = arith.addf %197, %196 : vector<16x128xf32>
    %199 = arith.divf %197, %198 : vector<16x128xf32>
    %200 = vector.extract_strided_slice %199 {offsets = [0, 0], sizes = [16, 64], strides = [1, 1]} : vector<16x128xf32> to vector<16x64xf32>
    %201 = vector.extract_strided_slice %199 {offsets = [0, 64], sizes = [16, 64], strides = [1, 1]} : vector<16x128xf32> to vector<16x64xf32>
    %202 = arith.mulf %200, %187 : vector<16x64xf32>
    %cst_77 = arith.constant dense<0.000000e+00> : vector<16x64xf32>
    %203 = tpu.matmul %9, %202, %cst_77 {dimension_numbers = #tpu.dot_dimension_numbers<[1], [0], [0], [1], [0, 0, 1, 1], [], []>} : vector<16x16xf32>, vector<16x64xf32>, vector<16x64xf32> -> vector<16x64xf32>
    %204 = vector.extract_strided_slice %190 {offsets = [0, 128], sizes = [16, 64], strides = [1, 1]} : vector<16x192xf32> to vector<16x64xf32>
    %cst_78 = arith.constant dense<0.000000e+00> : vector<16x64xf32>
    %205 = tpu.matmul %203, %11, %cst_78 {dimension_numbers = #tpu.dot_dimension_numbers<[1], [0], [0], [1], [0, 0, 1, 1], [], []>} : vector<16x64xf32>, vector<64x64xf32>, vector<16x64xf32> -> vector<16x64xf32>
    %206 = arith.addf %204, %205 : vector<16x64xf32>
    %207 = math.tanh %206 : vector<16x64xf32>
    %208 = arith.mulf %201, %187 : vector<16x64xf32>
    %cst_79 = arith.constant 1.000000e+00 : f32
    %209 = vector.broadcast %cst_79 : f32 to vector<16x64xf32>
    %210 = arith.subf %209, %201 : vector<16x64xf32>
    %211 = arith.mulf %210, %207 : vector<16x64xf32>
    %212 = arith.addf %208, %211 : vector<16x64xf32>
    %c8_i32 = arith.constant 8 : i32
    %c0_80 = arith.constant 0 : index
    %c0_81 = arith.constant 0 : index
    %213 = vector.load %arg7[%c0_80, %c0_81] : memref<64x12xf32, #tpu.memory_space<vmem>>, vector<64x12xf32>
    %cst_82 = arith.constant dense<0.000000e+00> : vector<16x12xf32>
    %214 = tpu.matmul %212, %213, %cst_82 {dimension_numbers = #tpu.dot_dimension_numbers<[1], [0], [0], [1], [0, 0, 1, 1], [], []>} : vector<16x64xf32>, vector<64x12xf32>, vector<16x12xf32> -> vector<16x12xf32>
    %cst_83 = arith.constant dense<0.000000e+00> : vector<12xf32>
    %215 = vector.multi_reduction <add>, %214, %cst_83 [0] : vector<16x12xf32> to vector<12xf32>
    %216 = vector.shape_cast %215 : vector<12xf32> to vector<1x12xf32>
    %cst_84 = arith.constant 6.250000e-02 : f32
    %217 = vector.broadcast %cst_84 : f32 to vector<1x12xf32>
    %218 = arith.mulf %216, %217 : vector<1x12xf32>
    %c0_85 = arith.constant 0 : index
    %c0_86 = arith.constant 0 : index
    %219 = vector.load %arg8[%c0_85, %c0_86] : memref<1x12xf32, #tpu.memory_space<vmem>>, vector<1x12xf32>
    %220 = arith.addf %218, %219 : vector<1x12xf32>
    %c0_87 = arith.constant 0 : index
    %c0_88 = arith.constant 0 : index
    %221 = vector.load %arg9[%c0_87, %c0_88] : memref<1x12xf32, #tpu.memory_space<vmem>>, vector<1x12xf32>
    tpu.vector_store %arg9[%c0_87, %c0_88], %220 {strides = array<i32>} : memref<1x12xf32, #tpu.memory_space<vmem>>, vector<1x12xf32>,
    return
  }
}

</mosaic_0001>

<bundles_post_ra>
// kernel: forward.1
= control target key start
LH: loop header
LB: loop body
LE: loop exit
PB: predicated region body
PF: predicated region fallthrough
CT: control target
= control target key end

     0   :  { %14 = vsyncpa [#allocation4], 0  ;;  %s4405_s30 = smov [#allocation3]   ;;  %s5381_s0 = inlined_call_operand.vmem [shape: f32[128,8], index: 0, kind: input, shape index: {}]   ;;  %s5382_s1 = inlined_call_operand.vmem [shape: f32[128,128], index: 1, kind: input, shape index: {}]   ;;  %s5383_s2 = inlined_call_operand.hbm [shape: f32[8,192], index: 2, kind: input, shape index: {}]   ;;  %s5384_s3 = inlined_call_operand.vmem [shape: f32[1,192], index: 3, kind: input, shape index: {}]   ;;  %s5385_s4 = inlined_call_operand.vmem [shape: f32[16,16], index: 4, kind: input, shape index: {}]   ;;  %s5386_s5 = inlined_call_operand.vmem [shape: f32[64,128], index: 5, kind: input, shape index: {}]   ;;  %s5387_s6 = inlined_call_operand.vmem [shape: f32[64,64], index: 6, kind: input, shape index: {}]   ;;  %s5388_s7 = inlined_call_operand.vmem [shape: f32[64,12], index: 7, kind: input, shape index: {}]   ;;  %s5389_s8 = inlined_call_operand.vmem [shape: f32[1,12], index: 8, kind: input, shape index: {}]   ;;  %s5390_s9 = inlined_call_operand.vmem [shape: f32[1,12], index: 9, kind: output, shape index: {}]  }
   0x1   :  { %s25_s10 = sshll.u32 %s4405_s30, 4  ;;  %s26_s10 = int_to_ptr.vmem [resolvable:$true] %s25_s10 }
   0x2   :  { %s4391_s11 = scalar_lea.vmem %s26_s10, 256  ;;  %p4396_p1 = scmp.lt.s32.totalorder %s26_s10, %s26_s10 }
   0x3   :  { %p4392_p0 = scmp.ne.s32.totalorder %s26_s10, %s4391_s11  ;;  %p4397_p2 = scmp.lt.s32.totalorder %s4391_s11, %s4391_s11 }
   0x5   :  { %p4398_p3 = por %p4397_p2, %p4396_p1 }
   0x7   :  { %p4399_p4 = pnand %p4398_p3, %p4392_p0 }
   0x9   :  { %4402 = shalt.err (!%p4399_p4)
}
   0xa   :  { %28 = dma.hbm_to_vmem [thread:$0]  %s5383_s2, 256, %s26_s10, [#allocation4]  }
   0xb   :  { %4403 = dma.done.wait [#allocation4], 256  }
   0xc   :  { %4404 = vsyncadd [#allocation4], 4294967040  ;;  %v4406_v0 = vmov 0.0   ;;  %v61_v1 = vld [vmem:[#allocation3 + $0x8] sm:$0xff]  ;;  %v60_v2 = vld [vmem:[#allocation3] sm:$0xff]  ;;  %vm62_vm0 = vcmask 64512  }
   0xd   :  { %175 = vmatprep.mubr.f32.mxu0 %v4406_v0  ;;  %364 = vmatprep.mubr.f32.mxu1 %v4406_v0  ;;  %v44_v3 = vld [vmem:[%s5381_s0] sm:$0xff]  ;;  %v45_v4 = vld [vmem:[%s5381_s0 + $0x8] sm:$0xff]  ;;  %v46_v5 = vld [vmem:[%s5381_s0 + $0x10] sm:$0xff]  ;;  %vm516_vm1 = vcmask 130048   ;;  %vm462_vm2 = vcmask 523264   ;;  %vm3482_vm3 = vcmask 97280  }
   0xe   :  { %141 = vmatprep.subr.mxu0 %v61_v1  ;;  %v47_v6 = vld [vmem:[%s5381_s0 + $0x18] sm:$0xff]  ;;  %v48_v7 = vld [vmem:[%s5381_s0 + $0x20] sm:$0xff]  ;;  %v49_v8 = vld [vmem:[%s5381_s0 + $0x28] sm:$0xff]  ;;  %vm3495_vm4 = vcmask 90112  }
   0xf   :  { %142 = vmatpush1.msra.mxu0 %v60_v2  ;;  %v50_v9 = vld [vmem:[%s5381_s0 + $0x30] sm:$0xff]  ;;  %v51_v10 = vld [vmem:[%s5381_s0 + $0x38] sm:$0xff]  ;;  %v52_v11 = vld [vmem:[%s5381_s0 + $0x40] sm:$0xff] }
  0x10   :  { %3502 = vmatmul.mubr.msk.f32.vlgmr.msra.gmra.mxu0 %vm62_vm0, %v44_v3  ;;  %3833 = vmatprep.subr.mxu0 %v4406_v0  ;;  %v53_v12 = vld [vmem:[%s5381_s0 + $0x48] sm:$0xff]  ;;  %v54_v13 = vld [vmem:[%s5381_s0 + $0x50] sm:$0xff]  ;;  %v55_v14 = vld [vmem:[%s5381_s0 + $0x58] sm:$0xff] }
  0x11   :  { %181 = vmatprep.mubr.f32.mxu0 %v4406_v0  ;;  %3834 = vmatpush3.msra.mxu0 %v4406_v0  ;;  %v56_v15 = vld [vmem:[%s5381_s0 + $0x60] sm:$0xff]  ;;  %v57_v16 = vld [vmem:[%s5381_s0 + $0x68] sm:$0xff]  ;;  %v58_v17 = vld [vmem:[%s5381_s0 + $0x70] sm:$0xff] }
  0x12   :  { %v59_v18 = vld [vmem:[%s5381_s0 + $0x78] sm:$0xff]  ;;  %v4546_v19 = vld [vmem:[%s5385_s4] sm:$0xff]  ;;  %v4554_v20 = vld [vmem:[%s5385_s4 + $0x8] sm:$0xff] }
  0x13   :  { %v4561_v21 = vld [vmem:[%s5386_s5 + $0x38] sm:$0xff]  ;;  %v4568_v22 = vld [vmem:[%s5386_s5 + $0x30] sm:$0xff]  ;;  %v4575_v23 = vld [vmem:[%s5386_s5 + $0x28] sm:$0xff] }
  0x14   :  { %3503 = vmatmul.mubr.msk.f32.gmra.mxu0 %vm62_vm0, %v45_v4  ;;  %3838 = vmatprep.subr.mxu0 %v4561_v21  ;;  %v4582_v24 = vld [vmem:[%s5386_s5 + $0x20] sm:$0xff]  ;;  %v4589_v25 = vld [vmem:[%s5386_s5 + $0x18] sm:$0xff]  ;;  %v4596_v26 = vld [vmem:[%s5386_s5 + $0x10] sm:$0xff] }
  0x15   :  { %187 = vmatprep.mubr.f32.mxu0 %v4406_v0  ;;  %v4603_v27 = vld [vmem:[%s5386_s5 + $0x8] sm:$0xff]  ;;  %v4610_v28 = vld [vmem:[%s5386_s5] sm:$0xff]  ;;  %v4638_v2 = vld [vmem:[%s5387_s6 + $0x38] sm:$0xff] }
  0x16   :  { %v272_v63 = vld [vmem:[%s5382_s1] sm:$0xff]  ;;  %v273_v1 = vld [vmem:[%s5382_s1 + $0x8] sm:$0xff]  ;;  %v274_v3 = vld [vmem:[%s5382_s1 + $0x10] sm:$0xff] }
  0x17   :  { %v4646_v4 = vld [vmem:[%s5387_s6 + $0x30] sm:$0xff] }
  0x18   :  { %3504 = vmatmul.mubr.msk.f32.gmra.mxu0 %vm62_vm0, %v46_v5  ;;  %v275_v5 = vld [vmem:[%s5382_s1 + $0x18] sm:$0xff] }
  0x19   :  { %193 = vmatprep.mubr.f32.mxu0 %v4406_v0 }
  0x1c   :  { %3505 = vmatmul.mubr.msk.f32.gmra.mxu0 %vm62_vm0, %v47_v6  ;;  %v4657_v6 = vld [vmem:[%s5387_s6 + $0x28] sm:$0xff] }
  0x1d   :  { %199 = vmatprep.mubr.f32.mxu0 %v4406_v0 }
  0x20   :  { %3506 = vmatmul.mubr.msk.f32.gmra.mxu0 %vm62_vm0, %v48_v7  ;;  %v4664_v7 = vld [vmem:[%s5387_s6 + $0x20] sm:$0xff] }
  0x21   :  { %205 = vmatprep.mubr.f32.mxu0 %v4406_v0 }
  0x24   :  { %3507 = vmatmul.mubr.msk.f32.gmra.mxu0 %vm62_vm0, %v49_v8  ;;  %v276_v8 = vld [vmem:[%s5382_s1 + $0x20] sm:$0xff] }
  0x25   :  { %211 = vmatprep.mubr.f32.mxu0 %v4406_v0 }
  0x28   :  { %3508 = vmatmul.mubr.msk.f32.gmra.mxu0 %vm62_vm0, %v50_v9  ;;  %v4675_v9 = vld [vmem:[%s5387_s6 + $0x18] sm:$0xff] }
  0x29   :  { %217 = vmatprep.mubr.f32.mxu0 %v4406_v0 }
  0x2c   :  { %3509 = vmatmul.mubr.msk.f32.gmra.mxu0 %vm62_vm0, %v51_v10  ;;  %v4682_v10 = vld [vmem:[%s5387_s6 + $0x10] sm:$0xff] }
  0x2d   :  { %223 = vmatprep.mubr.f32.mxu0 %v4406_v0 }
  0x30   :  { %3510 = vmatmul.mubr.msk.f32.gmra.mxu0 %vm62_vm0, %v52_v11  ;;  %v277_v11 = vld [vmem:[%s5382_s1 + $0x28] sm:$0xff] }
  0x31   :  { %229 = vmatprep.mubr.f32.mxu0 %v4406_v0 }
  0x34   :  { %3511 = vmatmul.mubr.msk.f32.gmra.mxu0 %vm62_vm0, %v53_v12  ;;  %v4693_v12 = vld [vmem:[%s5387_s6 + $0x8] sm:$0xff] }
  0x35   :  { %235 = vmatprep.mubr.f32.mxu0 %v4406_v0 }
  0x38   :  { %3512 = vmatmul.mubr.msk.f32.gmra.mxu0 %vm62_vm0, %v54_v13  ;;  %v4700_v13 = vld [vmem:[%s5387_s6] sm:$0xff] }
  0x39   :  { %241 = vmatprep.mubr.f32.mxu0 %v4406_v0 }
  0x3c   :  { %3513 = vmatmul.mubr.msk.f32.gmra.mxu0 %vm62_vm0, %v55_v14  ;;  %v278_v14 = vld [vmem:[%s5382_s1 + $0x30] sm:$0xff] }
  0x3d   :  { %247 = vmatprep.mubr.f32.mxu0 %v4406_v0 }
  0x40   :  { %3514 = vmatmul.mubr.msk.f32.gmra.mxu0 %vm62_vm0, %v56_v15  ;;  %v279_v15 = vld [vmem:[%s5382_s1 + $0x38] sm:$0xff] }
  0x41   :  { %253 = vmatprep.mubr.f32.mxu0 %v4406_v0 }
  0x44   :  { %3515 = vmatmul.mubr.msk.f32.gmra.mxu0 %vm62_vm0, %v57_v16  ;;  %v280_v16 = vld [vmem:[%s5382_s1 + $0x40] sm:$0xff] }
  0x45   :  { %259 = vmatprep.mubr.f32.mxu0 %v4406_v0 }
  0x48   :  { %3516 = vmatmul.mubr.msk.f32.gmra.mxu0 %vm62_vm0, %v58_v17  ;;  %v281_v17 = vld [vmem:[%s5382_s1 + $0x48] sm:$0xff] }
  0x49   :  { %265 = vmatprep.mubr.f32.mxu0 %v4406_v0 }
  0x4c   :  { %3517 = vmatmul.mubr.msk.f32.gmra.mxu0 %vm62_vm0, %v59_v18  ;;  %v282_v18 = vld [vmem:[%s5382_s1 + $0x50] sm:$0xff] }
  0x4d   :  { %3835 = vmatprep.mubr.msk.f32.mxu0 %vm516_vm1, %v4546_v19 }
  0x50   :  { %3836 = vmatmul.mubr.msk.f32.vlgmr.msra.gmra.mxu0 %vm516_vm1, %v4554_v20 }
  0x51   :  { %3839 = vmatpush3.msra.mxu0 %v4561_v21 }
  0x52   :  { %3840 = vmatprep.subr.mxu0 %v4568_v22 }
  0x53   :  { %3841 = vmatpush3.msra.mxu0 %v4568_v22 }
  0x54   :  { %3842 = vmatprep.subr.mxu0 %v4575_v23 }
  0x55   :  { %3843 = vmatpush3.msra.mxu0 %v4575_v23 }
  0x56   :  { %3844 = vmatprep.subr.mxu0 %v4582_v24 }
  0x57   :  { %3845 = vmatpush3.msra.mxu0 %v4582_v24 }
  0x58   :  { %3846 = vmatprep.subr.mxu0 %v4589_v25 }
  0x59   :  { %3847 = vmatpush3.msra.mxu0 %v4589_v25 }
  0x5a   :  { %3848 = vmatprep.subr.mxu0 %v4596_v26 }
  0x5b   :  { %3849 = vmatpush3.msra.mxu0 %v4596_v26 }
  0x5c   :  { %3850 = vmatprep.subr.mxu0 %v4603_v27 }
  0x5d   :  { %3851 = vmatpush3.msra.mxu0 %v4603_v27 }
  0x5e   :  { %3852 = vmatprep.subr.mxu0 %v4610_v28 }
  0x5f   :  { %3853 = vmatpush3.msra.mxu0 %v4610_v28 }
  0xd0   :  { %v4614_v29 = vpop.f32.mrf.mxu0 }
  0xd2   :  { %v4616_v30 = vpop.f32.mrf.mxu0 }
  0xd4   :  { %v4618_v31 = vpop.f32.mrf.mxu0 }
  0xd6   :  { %v185_v32 = vpop.f32.mrf.mxu0 }
  0xd8   :  { %v189_v33 = vpop.f32.mrf.mxu0 }
  0xda   :  { %v191_v34 = vpop.f32.mrf.mxu0 }
  0xdc   :  { %v195_v35 = vpop.f32.mrf.mxu0 }
  0xde   :  { %v197_v36 = vpop.f32.mrf.mxu0 }
  0xe0   :  { %v201_v37 = vpop.f32.mrf.mxu0 }
  0xe2   :  { %v203_v38 = vpop.f32.mrf.mxu0 }
  0xe4   :  { %v207_v39 = vpop.f32.mrf.mxu0 }
  0xe6   :  { %v209_v40 = vpop.f32.mrf.mxu0 }
  0xe8   :  { %v213_v41 = vpop.f32.mrf.mxu0 }
  0xea   :  { %v215_v42 = vpop.f32.mrf.mxu0 }
  0xec   :  { %v219_v43 = vpop.f32.mrf.mxu0 }
  0xee   :  { %v221_v44 = vpop.f32.mrf.mxu0 }
  0xf0   :  { %v225_v45 = vpop.f32.mrf.mxu0 }
  0xf2   :  { %v227_v46 = vpop.f32.mrf.mxu0 }
  0xf4   :  { %v231_v47 = vpop.f32.mrf.mxu0 }
  0xf6   :  { %v233_v48 = vpop.f32.mrf.mxu0 }
  0xf8   :  { %v237_v49 = vpop.f32.mrf.mxu0 }
  0xfa   :  { %v239_v50 = vpop.f32.mrf.mxu0 }
  0xfc   :  { %v243_v51 = vpop.f32.mrf.mxu0 }
  0xfe   :  { %v245_v52 = vpop.f32.mrf.mxu0 }
 0x100   :  { %v249_v53 = vpop.f32.mrf.mxu0 }
 0x102   :  { %v251_v54 = vpop.f32.mrf.mxu0 }
 0x104   :  { %v255_v55 = vpop.f32.mrf.mxu0 }
 0x106   :  { %v257_v56 = vpop.f32.mrf.mxu0 }
 0x108   :  { %v261_v57 = vpop.f32.mrf.mxu0 }
 0x10a   :  { %v263_v58 = vpop.f32.mrf.mxu0 }
 0x10c   :  { %v267_v59 = vpop.f32.mrf.mxu0 }
 0x10e   :  { %v269_v60 = vpop.f32.mrf.mxu0 }
 0x10f   :  { %300 = vmatprep.subr.mxu1 %v269_v60 }
 0x110   :  { %301 = vmatpush1.msra.mxu1 %v267_v59  ;;  %v3837_v61 = vpop.f32.mrf.mxu0 }
 0x111   :  { %302 = vmatprep.subr.mxu1 %v263_v58 }
 0x112   :  { %303 = vmatpush1.msra.mxu1 %v261_v57  ;;  %v589_v62 = vpop.f32.mrf.mxu0 }
 0x113   :  { %304 = vmatprep.subr.mxu1 %v257_v56  ;;  %3854 = vmatprep.mubr.msk.f32.mxu0 %vm462_vm2, %v589_v62 }
 0x114   :  { %305 = vmatpush1.msra.mxu1 %v255_v55  ;;  %3855 = vmatmul.mubr.msk.f32.vlgmr.msra.gmra.mxu0 %vm462_vm2, %v3837_v61 }
 0x115   :  { %306 = vmatprep.subr.mxu1 %v251_v54  ;;  %3861 = vmatprep.mubr.msk.f32.mxu0 %vm516_vm1, %v4546_v19 }
 0x116   :  { %307 = vmatpush1.msra.mxu1 %v249_v53 }
 0x117   :  { %308 = vmatprep.subr.mxu1 %v245_v52 }
 0x118   :  { %309 = vmatpush1.msra.mxu1 %v243_v51 }
 0x119   :  { %310 = vmatprep.subr.mxu1 %v239_v50 }
 0x11a   :  { %311 = vmatpush1.msra.mxu1 %v237_v49 }
 0x11b   :  { %312 = vmatprep.subr.mxu1 %v233_v48 }
 0x11c   :  { %313 = vmatpush1.msra.mxu1 %v231_v47 }
 0x11d   :  { %314 = vmatprep.subr.mxu1 %v227_v46 }
 0x11e   :  { %315 = vmatpush1.msra.mxu1 %v225_v45 }
 0x11f   :  { %316 = vmatprep.subr.mxu1 %v221_v44 }
 0x120   :  { %317 = vmatpush1.msra.mxu1 %v219_v43 }
 0x121   :  { %318 = vmatprep.subr.mxu1 %v215_v42 }
 0x122   :  { %319 = vmatpush1.msra.mxu1 %v213_v41 }
 0x123   :  { %320 = vmatprep.subr.mxu1 %v209_v40 }
 0x124   :  { %321 = vmatpush1.msra.mxu1 %v207_v39 }
 0x125   :  { %322 = vmatprep.subr.mxu1 %v203_v38 }
 0x126   :  { %323 = vmatpush1.msra.mxu1 %v201_v37  ;;  %v288_v37 = vld [vmem:[%s5384_s3] sm:$0x3] }
 0x127   :  { %324 = vmatprep.subr.mxu1 %v197_v36 }
 0x128   :  { %325 = vmatpush1.msra.mxu1 %v195_v35 }
 0x129   :  { %326 = vmatprep.subr.mxu1 %v191_v34  ;;  %v290_v34 = vlaneseq }
 0x12a   :  { %327 = vmatpush1.msra.mxu1 %v189_v33  ;;  %v287_v33 = vld [vmem:[%s5382_s1 + $0x78] sm:$0xff] }
 0x12b   :  { %328 = vmatprep.subr.mxu1 %v185_v32  ;;  %v286_v32 = vld [vmem:[%s5382_s1 + $0x70] sm:$0xff]  ;;  %v291_v35 = vshrl.u32 %v290_v34, 7 }
 0x12c   :  { %329 = vmatpush1.msra.mxu1 %v4618_v31  ;;  %v285_v31 = vld [vmem:[%s5382_s1 + $0x68] sm:$0xff] }
 0x12d   :  { %330 = vmatprep.subr.mxu1 %v4616_v30  ;;  %v284_v30 = vld [vmem:[%s5382_s1 + $0x60] sm:$0xff]  ;;  %v292_v36 = vsub.s32 0, %v291_v35  ;;  %v296_v38 = vsub.s32 1, %v291_v35 }
 0x12e   :  { %331 = vmatpush1.msra.mxu1 %v4614_v29  ;;  %v283_v29 = vld [vmem:[%s5382_s1 + $0x58] sm:$0xff]  ;;  %s4407_s1 = smov 64  }
 0x12f   :  { %365 = vmatmul.mubr.f32.vlgmr.msra.gmra.mxu1 %v272_v63  ;;  %3864 = vmatprep.subr.mxu1 %v4638_v2  ;;  %v4749_v40 = vrot.slane %v288_v37, %v292_v36  ;;  %v4751_v41 = vrot.slane %v288_v37, %v296_v38 }
 0x130   :  { %370 = vmatprep.mubr.f32.mxu1 %v4406_v0  ;;  %3865 = vmatpush3.msra.mxu1 %v4638_v2 }
 0x131   :  { %3866 = vmatprep.subr.mxu1 %v4646_v4 }
 0x132   :  { %3867 = vmatpush3.msra.mxu1 %v4646_v4 }
 0x133   :  { %371 = vmatmul.mubr.f32.gmra.mxu1 %v273_v1  ;;  %3868 = vmatprep.subr.mxu1 %v4657_v6 }
 0x134   :  { %376 = vmatprep.mubr.f32.mxu1 %v4406_v0  ;;  %3869 = vmatpush3.msra.mxu1 %v4657_v6 }
 0x135   :  { %3870 = vmatprep.subr.mxu1 %v4664_v7 }
 0x136   :  { %3871 = vmatpush3.msra.mxu1 %v4664_v7 }
 0x137   :  { %377 = vmatmul.mubr.f32.gmra.mxu1 %v274_v3  ;;  %3872 = vmatprep.subr.mxu1 %v4675_v9 }
 0x138   :  { %382 = vmatprep.mubr.f32.mxu1 %v4406_v0  ;;  %3873 = vmatpush3.msra.mxu1 %v4675_v9 }
 0x139   :  { %3874 = vmatprep.subr.mxu1 %v4682_v10 }
 0x13a   :  { %3875 = vmatpush3.msra.mxu1 %v4682_v10 }
 0x13b   :  { %383 = vmatmul.mubr.f32.gmra.mxu1 %v275_v5  ;;  %3876 = vmatprep.subr.mxu1 %v4693_v12 }
 0x13c   :  { %388 = vmatprep.mubr.f32.mxu1 %v4406_v0  ;;  %3877 = vmatpush3.msra.mxu1 %v4693_v12 }
 0x13d   :  { %3878 = vmatprep.subr.mxu1 %v4700_v13 }
 0x13e   :  { %3879 = vmatpush3.msra.mxu1 %v4700_v13 }
 0x13f   :  { %389 = vmatmul.mubr.f32.gmra.mxu1 %v276_v8 }
 0x140   :  { %394 = vmatprep.mubr.f32.mxu1 %v4406_v0 }
 0x143   :  { %395 = vmatmul.mubr.f32.gmra.mxu1 %v277_v11 }
 0x144   :  { %400 = vmatprep.mubr.f32.mxu1 %v4406_v0 }
 0x147   :  { %401 = vmatmul.mubr.f32.gmra.mxu1 %v278_v14 }
 0x148   :  { %406 = vmatprep.mubr.f32.mxu1 %v4406_v0 }
 0x14b   :  { %407 = vmatmul.mubr.f32.gmra.mxu1 %v279_v15 }
 0x14c   :  { %412 = vmatprep.mubr.f32.mxu1 %v4406_v0 }
 0x14f   :  { %413 = vmatmul.mubr.f32.gmra.mxu1 %v280_v16 }
 0x150   :  { %418 = vmatprep.mubr.f32.mxu1 %v4406_v0 }
 0x153   :  { %419 = vmatmul.mubr.f32.gmra.mxu1 %v281_v17 }
 0x154   :  { %424 = vmatprep.mubr.f32.mxu1 %v4406_v0 }
 0x157   :  { %425 = vmatmul.mubr.f32.gmra.mxu1 %v282_v18 }
 0x158   :  { %430 = vmatprep.mubr.f32.mxu1 %v4406_v0 }
 0x15b   :  { %431 = vmatmul.mubr.f32.gmra.mxu1 %v283_v29 }
 0x15c   :  { %436 = vmatprep.mubr.f32.mxu1 %v4406_v0 }
 0x15f   :  { %437 = vmatmul.mubr.f32.gmra.mxu1 %v284_v30 }
 0x160   :  { %442 = vmatprep.mubr.f32.mxu1 %v4406_v0 }
 0x163   :  { %443 = vmatmul.mubr.f32.gmra.mxu1 %v285_v31 }
 0x164   :  { %448 = vmatprep.mubr.f32.mxu1 %v4406_v0 }
 0x167   :  { %449 = vmatmul.mubr.f32.gmra.mxu1 %v286_v32 }
 0x168   :  { %454 = vmatprep.mubr.f32.mxu1 %v4406_v0 }
 0x16b   :  { %455 = vmatmul.mubr.f32.gmra.mxu1 %v287_v33 }
 0x1d4   :  { %v3856_v39 = vpop.f32.mrf.mxu0 }
 0x1d6   :  { %v670_v0 = vpop.f32.mrf.mxu0 }
 0x1ef   :  { %v366_v42 = vpop.f32.mrf.mxu1 }
 0x1f0   :  { %v367_v43 = vadd.f32 %v366_v42, %v4749_v40 }
 0x1f1   :  { %v368_v44 = vpop.f32.mrf.mxu1 }
 0x1f2   :  { %v369_v45 = vadd.f32 %v368_v44, %v4751_v41  ;;  %v679_v46 = vadd.f32 %v670_v0, %v367_v43 }
 0x1f3   :  { %v372_v47 = vpop.f32.mrf.mxu1 }
 0x1f4   :  { %463 = vst.msk [vmem:[#allocation2 + $0x8] sm:$0xff] %vm462_vm2, %v369_v45  ;;  %v373_v48 = vadd.f32 %v372_v47, %v4749_v40  ;;  %v3522_v49 = vmul.f32 -1.442695, %v679_v46 }
 0x1f5   :  { %v374_v50 = vpop.f32.mrf.mxu1 }
 0x1f6   :  { %v375_v51 = vadd.f32 %v374_v50, %v4751_v41  ;;  %v680_v52 = vadd.f32 %v3856_v39, %v373_v48  ;;  %4269 = vpow2.f32 %v3522_v49 }
 0x1f7   :  { %v378_v62 = vpop.f32.mrf.mxu1 }
 0x1f8   :  { %465 = vst.msk [vmem:[#allocation2 + $0x18] sm:$0xff] %vm462_vm2, %v375_v51  ;;  %v3523_v53 = vmul.f32 -1.442695, %v680_v52  ;;  %v4792_v63 = vadd.f32 %v378_v62, %v4749_v40 }
 0x1f9   :  { %v380_v1 = vpop.f32.mrf.mxu1 }
 0x1fa   :  { %4271 = vpow2.f32 %v3523_v53  ;;  %v381_v3 = vadd.f32 %v380_v1, %v4751_v41 }
 0x1fb   :  { %v384_v5 = vpop.f32.mrf.mxu1 }
 0x1fc   :  { %467 = vst.msk [vmem:[#allocation2 + $0x28] sm:$0xff] %vm462_vm2, %v381_v3  ;;  %v4797_v8 = vadd.f32 %v384_v5, %v4749_v40 }
 0x1fd   :  { %v386_v11 = vpop.f32.mrf.mxu1 }
 0x1fe   :  { %v387_v14 = vadd.f32 %v386_v11, %v4751_v41 }
 0x1ff   :  { %v390_v15 = vpop.f32.mrf.mxu1 }
 0x200   :  { %469 = vst.msk [vmem:[#allocation2 + $0x38] sm:$0xff] %vm462_vm2, %v387_v14  ;;  %v4802_v16 = vadd.f32 %v390_v15, %v4749_v40 }
 0x201   :  { %v392_v17 = vpop.f32.mrf.mxu1 }
 0x202   :  { %v393_v18 = vadd.f32 %v392_v17, %v4751_v41 }
 0x203   :  { %v4270_v54 = vpop.eup %4269  ;;  %v396_v29 = vpop.f32.mrf.mxu1 }
 0x204   :  { %v687_v55 = vadd.f32 1.0, %v4270_v54  ;;  %471 = vst.msk [vmem:[#allocation2 + $0x48] sm:$0xff] %vm462_vm2, %v393_v18  ;;  %v4807_v30 = vadd.f32 %v396_v29, %v4749_v40 }
 0x205   :  { %v398_v31 = vpop.f32.mrf.mxu1 }
 0x206   :  { %4273 = vrcp.f32 %v687_v55  ;;  %v399_v32 = vadd.f32 %v398_v31, %v4751_v41 }
 0x207   :  { %v4272_v56 = vpop.eup %4271  ;;  %v402_v33 = vpop.f32.mrf.mxu1 }
 0x208   :  { %v688_v57 = vadd.f32 1.0, %v4272_v56  ;;  %473 = vst.msk [vmem:[#allocation2 + $0x58] sm:$0xff] %vm462_vm2, %v399_v32  ;;  %v4812_v34 = vadd.f32 %v402_v33, %v4749_v40 }
 0x209   :  { %v404_v35 = vpop.f32.mrf.mxu1 }
 0x20a   :  { %4275 = vrcp.f32 %v688_v57  ;;  %v405_v36 = vadd.f32 %v404_v35, %v4751_v41 }
 0x20b   :  { %v408_v37 = vpop.f32.mrf.mxu1 }
 0x20c   :  { %475 = vst.msk [vmem:[#allocation2 + $0x68] sm:$0xff] %vm462_vm2, %v405_v36  ;;  %v4817_v38 = vadd.f32 %v408_v37, %v4749_v40 }
 0x20d   :  { %v410_v39 = vpop.f32.mrf.mxu1 }
 0x20e   :  { %v411_v42 = vadd.f32 %v410_v39, %v4751_v41 }
 0x20f   :  { %v414_v0 = vpop.f32.mrf.mxu1 }
 0x210   :  { %477 = vst.msk [vmem:[#allocation2 + $0x78] sm:$0xff] %vm462_vm2, %v411_v42  ;;  %v4822_v43 = vadd.f32 %v414_v0, %v4749_v40  ;;  %v515_v0 = vld [vmem:[#allocation2 + $0x18] sm:$0xff] }
 0x211   :  { %v416_v44 = vpop.f32.mrf.mxu1 }
 0x212   :  { %v417_v45 = vadd.f32 %v416_v44, %v4751_v41 }
 0x213   :  { %v4759_v58 = vpop.eup %4273  ;;  %v420_v46 = vpop.f32.mrf.mxu1 }
 0x214   :  { %v4768_v61 = vmul.f32 0.0, %v4759_v58  ;;  %479 = vst.msk [vmem:[#allocation2 + $0x88] sm:$0xff] %vm462_vm2, %v417_v45  ;;  %v4827_v47 = vadd.f32 %v420_v46, %v4749_v40  ;;  %v513_v46 = vld [vmem:[#allocation2 + $0x8] sm:$0xff] }
 0x215   :  { %v422_v48 = vpop.f32.mrf.mxu1 }
 0x216   :  { %v423_v49 = vadd.f32 %v422_v48, %v4751_v41 }
 0x217   :  { %v4761_v59 = vpop.eup %4275  ;;  %v426_v50 = vpop.f32.mrf.mxu1 }
 0x218   :  { %v4764_v60 = vmul.f32 0.0, %v4761_v59  ;;  %481 = vst.msk [vmem:[#allocation2 + $0x98] sm:$0xff] %vm462_vm2, %v423_v49  ;;  %v4832_v51 = vadd.f32 %v426_v50, %v4749_v40  ;;  %v856_v50 = vsub.f32 1.0, %v4761_v59 }
 0x219   :  { %v428_v52 = vpop.f32.mrf.mxu1 }
 0x21a   :  { %3857 = vmatprep.subr.mxu0 %v4764_v60  ;;  %v429_v53 = vadd.f32 %v428_v52, %v4751_v41 }
 0x21b   :  { %3858 = vmatpush3.msra.mxu0 %v4764_v60  ;;  %v432_v54 = vpop.f32.mrf.mxu1 }
 0x21c   :  { %3859 = vmatprep.subr.mxu0 %v4768_v61  ;;  %483 = vst.msk [vmem:[#allocation2 + $0xa8] sm:$0xff] %vm462_vm2, %v429_v53  ;;  %v4837_v55 = vadd.f32 %v432_v54, %v4749_v40  ;;  %v855_v54 = vsub.f32 1.0, %v4759_v58 }
 0x21d   :  { %3860 = vmatpush3.msra.mxu0 %v4768_v61  ;;  %v434_v56 = vpop.f32.mrf.mxu1 }
 0x21e   :  { %3862 = vmatmul.mubr.msk.f32.vlgmr.msra.gmra.mxu0 %vm516_vm1, %v4554_v20  ;;  %3890 = vmatprep.subr.mxu0 %v4561_v21  ;;  %v435_v57 = vadd.f32 %v434_v56, %v4751_v41 }
 0x21f   :  { %3891 = vmatpush3.msra.mxu0 %v4561_v21  ;;  %v438_v62 = vpop.f32.mrf.mxu1 }
 0x220   :  { %3892 = vmatprep.subr.mxu0 %v4568_v22  ;;  %485 = vst.msk [vmem:[#allocation2 + $0xb8] sm:$0xff] %vm462_vm2, %v435_v57  ;;  %v439_v1 = vadd.f32 %v438_v62, %v4749_v40 }
 0x221   :  { %3893 = vmatpush3.msra.mxu0 %v4568_v22  ;;  %v440_v3 = vpop.f32.mrf.mxu1 }
 0x222   :  { %3894 = vmatprep.subr.mxu0 %v4575_v23  ;;  %486 = vst [vmem:[#allocation2 + $0xc0] sm:$0xff] %v439_v1  ;;  %v441_v5 = vadd.f32 %v440_v3, %v4751_v41 }
 0x223   :  { %3895 = vmatpush3.msra.mxu0 %v4575_v23  ;;  %v444_v11 = vpop.f32.mrf.mxu1 }
 0x224   :  { %3896 = vmatprep.subr.mxu0 %v4582_v24  ;;  %487 = vst.msk [vmem:[#allocation2 + $0xc8] sm:$0xff] %vm462_vm2, %v441_v5  ;;  %v445_v14 = vadd.f32 %v444_v11, %v4749_v40 }
 0x225   :  { %3897 = vmatpush3.msra.mxu0 %v4582_v24  ;;  %v446_v15 = vpop.f32.mrf.mxu1 }
 0x226   :  { %3898 = vmatprep.subr.mxu0 %v4589_v25  ;;  %488 = vst [vmem:[#allocation2 + $0xd0] sm:$0xff] %v445_v14  ;;  %v447_v17 = vadd.f32 %v446_v15, %v4751_v41 }
 0x227   :  { %3899 = vmatpush3.msra.mxu0 %v4589_v25  ;;  %v450_v18 = vpop.f32.mrf.mxu1 }
 0x228   :  { %3900 = vmatprep.subr.mxu0 %v4596_v26  ;;  %489 = vst.msk [vmem:[#allocation2 + $0xd8] sm:$0xff] %vm462_vm2, %v447_v17  ;;  %v451_v29 = vadd.f32 %v450_v18, %v4749_v40 }
 0x229   :  { %3901 = vmatpush3.msra.mxu0 %v4596_v26  ;;  %v452_v31 = vpop.f32.mrf.mxu1 }
 0x22a   :  { %3902 = vmatprep.subr.mxu0 %v4603_v27  ;;  %490 = vst [vmem:[#allocation2 + $0xe0] sm:$0xff] %v451_v29  ;;  %v453_v32 = vadd.f32 %v452_v31, %v4751_v41 }
 0x22b   :  { %3903 = vmatpush3.msra.mxu0 %v4603_v27  ;;  %v456_v33 = vpop.f32.mrf.mxu1 }
 0x22c   :  { %3904 = vmatprep.subr.mxu0 %v4610_v28  ;;  %491 = vst.msk [vmem:[#allocation2 + $0xe8] sm:$0xff] %vm462_vm2, %v453_v32  ;;  %v457_v35 = vadd.f32 %v456_v33, %v4749_v40 }
 0x22d   :  { %3905 = vmatpush3.msra.mxu0 %v4610_v28  ;;  %v458_v36 = vpop.f32.mrf.mxu1 }
 0x22e   :  { %492 = vst [vmem:[#allocation2 + $0xf0] sm:$0xff] %v457_v35  ;;  %v459_v37 = vadd.f32 %v458_v36, %v4751_v41 }
 0x230   :  { %493 = vst.msk [vmem:[#allocation2 + $0xf8] sm:$0xff] %vm462_vm2, %v459_v37 }
 0x2de   :  { %v3863_v39 = vpop.f32.mrf.mxu0 }
 0x2e0   :  { %v761_v42 = vpop.f32.mrf.mxu0 }
 0x2e1   :  { %3880 = vmatprep.mubr.msk.f32.mxu1 %vm462_vm2, %v761_v42 }
 0x2e2   :  { %3881 = vmatmul.mubr.msk.f32.vlgmr.msra.gmra.mxu1 %vm462_vm2, %v3863_v39  ;;  %v872_v39 = vld [vmem:[#allocation2 + $0x38] sm:$0xff] }
 0x2e3   :  { %3887 = vmatprep.mubr.msk.f32.mxu1 %vm516_vm1, %v4546_v19 }
 0x3a2   :  { %v3882_v44 = vpop.f32.mrf.mxu1 }
 0x3a3   :  { %v852_v45 = vadd.f32 %v3882_v44, %v515_v0  ;;  %v870_v44 = vld [vmem:[#allocation2 + $0x28] sm:$0xff] }
 0x3a4   :  { %v842_v40 = vpop.f32.mrf.mxu1 }
 0x3a5   :  { %4277 = vtanh.f32 %v852_v45  ;;  %v851_v48 = vadd.f32 %v842_v40, %v513_v46 }
 0x3a7   :  { %4279 = vtanh.f32 %v851_v48 }
 0x3b2   :  { %v4278_v41 = vpop.eup %4277 }
 0x3b3   :  { %861 = vrot.lane.b32.xlu0 %v4278_v41, %s4407_s1 }
 0x3b4   :  { %v4280_v49 = vpop.eup %4279 }
 0x3b7   :  { %859 = vrot.lane.b32.xlu0 %v4280_v49, %s4407_s1 }
 0x425   :  { %v862_v52 = vpop.permute.xlu0 %861 }
 0x426   :  { %v866_v53 = vmul.f32 %v862_v52, %v856_v50 }
 0x428   :  { %v4862_v56 = vadd.f32 %v866_v53, %v4764_v60 }
 0x429   :  { %v860_v57 = vpop.permute.xlu0 %859 }
 0x42a   :  { %v865_v62 = vmul.f32 %v860_v57, %v855_v54  ;;  %877 = vrot.lane.b32.xlu1 %v4862_v56, %s4407_s1 }
 0x42c   :  { %v4867_v1 = vadd.f32 %v865_v62, %v4768_v61 }
 0x42e   :  { %875 = vrot.lane.b32.xlu1 %v4867_v1, %s4407_s1 }
 0x49c   :  { %v878_v3 = vpop.permute.xlu1 %877 }
 0x49d   :  { %3883 = vmatprep.subr.mxu1 %v878_v3 }
 0x49e   :  { %3884 = vmatpush3.msra.mxu1 %v878_v3 }
 0x4a0   :  { %v876_v59 = vpop.permute.xlu1 %875 }
 0x4a1   :  { %3885 = vmatprep.subr.mxu1 %v876_v59 }
 0x4a2   :  { %3886 = vmatpush3.msra.mxu1 %v876_v59 }
 0x4a3   :  { %3888 = vmatmul.mubr.msk.f32.vlgmr.msra.gmra.mxu1 %vm516_vm1, %v4554_v20 }
 0x4a4   :  { %3913 = vmatprep.mubr.msk.f32.mxu1 %vm516_vm1, %v4546_v19 }
 0x563   :  { %v3889_v58 = vpop.f32.mrf.mxu1 }
 0x565   :  { %v947_v60 = vpop.f32.mrf.mxu1 }
 0x566   :  { %3906 = vmatprep.mubr.msk.f32.mxu0 %vm462_vm2, %v947_v60 }
 0x567   :  { %3907 = vmatmul.mubr.msk.f32.vlgmr.msra.gmra.mxu0 %vm462_vm2, %v3889_v58 }
 0x568   :  { %3939 = vmatprep.mubr.msk.f32.mxu0 %vm516_vm1, %v4546_v19 }
 0x627   :  { %v3908_v61 = vpop.f32.mrf.mxu0 }
 0x628   :  { %v1038_v5 = vadd.f32 %v3908_v61, %v4797_v8 }
 0x629   :  { %v1028_v11 = vpop.f32.mrf.mxu0 }
 0x62a   :  { %v3533_v14 = vmul.f32 -1.442695, %v1038_v5  ;;  %v1037_v15 = vadd.f32 %v1028_v11, %v4792_v63 }
 0x62c   :  { %4281 = vpow2.f32 %v3533_v14  ;;  %v3532_v17 = vmul.f32 -1.442695, %v1037_v15 }
 0x62e   :  { %4283 = vpow2.f32 %v3532_v17 }
 0x639   :  { %v4282_v18 = vpop.eup %4281 }
 0x63a   :  { %v1046_v29 = vadd.f32 1.0, %v4282_v18 }
 0x63b   :  { %v4284_v31 = vpop.eup %4283 }
 0x63c   :  { %4285 = vrcp.f32 %v1046_v29  ;;  %v1045_v32 = vadd.f32 1.0, %v4284_v31  ;;  %v1230_v31 = vld [vmem:[#allocation2 + $0x48] sm:$0xff] }
 0x63e   :  { %4287 = vrcp.f32 %v1045_v32 }
 0x649   :  { %v4286_v33 = vpop.eup %4285 }
 0x64a   :  { %v1052_v35 = vmul.f32 %v4286_v33, %v878_v3  ;;  %v1216_v41 = vsub.f32 1.0, %v4286_v33  ;;  %v1214_v50 = vmul.f32 %v4286_v33, %v4862_v56 }
 0x64b   :  { %v4288_v36 = vpop.eup %4287 }
 0x64c   :  { %3909 = vmatprep.subr.mxu1 %v1052_v35  ;;  %v1051_v37 = vmul.f32 %v4288_v36, %v876_v59  ;;  %v1215_v53 = vsub.f32 1.0, %v4288_v36  ;;  %v1213_v62 = vmul.f32 %v4288_v36, %v4867_v1 }
 0x64d   :  { %3910 = vmatpush3.msra.mxu1 %v1052_v35 }
 0x64e   :  { %3911 = vmatprep.subr.mxu1 %v1051_v37 }
 0x64f   :  { %3912 = vmatpush3.msra.mxu1 %v1051_v37 }
 0x650   :  { %3914 = vmatmul.mubr.msk.f32.vlgmr.msra.gmra.mxu1 %vm516_vm1, %v4554_v20  ;;  %3916 = vmatprep.subr.mxu1 %v4638_v2 }
 0x651   :  { %3917 = vmatpush3.msra.mxu1 %v4638_v2 }
 0x652   :  { %3918 = vmatprep.subr.mxu1 %v4646_v4 }
 0x653   :  { %3919 = vmatpush3.msra.mxu1 %v4646_v4 }
 0x654   :  { %3920 = vmatprep.subr.mxu1 %v4657_v6 }
 0x655   :  { %3921 = vmatpush3.msra.mxu1 %v4657_v6 }
 0x656   :  { %3922 = vmatprep.subr.mxu1 %v4664_v7 }
 0x657   :  { %3923 = vmatpush3.msra.mxu1 %v4664_v7 }
 0x658   :  { %3924 = vmatprep.subr.mxu1 %v4675_v9 }
 0x659   :  { %3925 = vmatpush3.msra.mxu1 %v4675_v9 }
 0x65a   :  { %3926 = vmatprep.subr.mxu1 %v4682_v10 }
 0x65b   :  { %3927 = vmatpush3.msra.mxu1 %v4682_v10 }
 0x65c   :  { %3928 = vmatprep.subr.mxu1 %v4693_v12 }
 0x65d   :  { %3929 = vmatpush3.msra.mxu1 %v4693_v12 }
 0x65e   :  { %3930 = vmatprep.subr.mxu1 %v4700_v13 }
 0x65f   :  { %3931 = vmatpush3.msra.mxu1 %v4700_v13 }
 0x710   :  { %v3915_v63 = vpop.f32.mrf.mxu1 }
 0x712   :  { %v1119_v8 = vpop.f32.mrf.mxu1 }
 0x713   :  { %3932 = vmatprep.mubr.msk.f32.mxu1 %vm462_vm2, %v1119_v8 }
 0x714   :  { %3933 = vmatmul.mubr.msk.f32.vlgmr.msra.gmra.mxu1 %vm462_vm2, %v3915_v63 }
 0x715   :  { %3965 = vmatprep.mubr.msk.f32.mxu1 %vm516_vm1, %v4546_v19 }
 0x7d4   :  { %v3934_v42 = vpop.f32.mrf.mxu1 }
 0x7d5   :  { %v1210_v0 = vadd.f32 %v3934_v42, %v872_v39 }
 0x7d6   :  { %v1200_v45 = vpop.f32.mrf.mxu1 }
 0x7d7   :  { %4289 = vtanh.f32 %v1210_v0  ;;  %v1209_v46 = vadd.f32 %v1200_v45, %v870_v44 }
 0x7d9   :  { %4291 = vtanh.f32 %v1209_v46 }
 0x7e4   :  { %v4290_v40 = vpop.eup %4289 }
 0x7e5   :  { %1221 = vrot.lane.b32.xlu0 %v4290_v40, %s4407_s1 }
 0x7e6   :  { %v4292_v48 = vpop.eup %4291 }
 0x7e7   :  { %1219 = vrot.lane.b32.xlu1 %v4292_v48, %s4407_s1 }
 0x857   :  { %v1222_v49 = vpop.permute.xlu0 %1221 }
 0x858   :  { %v1226_v52 = vmul.f32 %v1222_v49, %v1216_v41  ;;  %v4976_v41 = vld [vmem:[%s5385_s4 + $0x8] sm:$0xff]  ;;  %v4983_v49 = vld [vmem:[%s5386_s5 + $0x38] sm:$0xff] }
 0x859   :  { %v1220_v54 = vpop.permute.xlu1 %1219 }
 0x85a   :  { %v4906_v57 = vadd.f32 %v1226_v52, %v1214_v50  ;;  %v1225_v3 = vmul.f32 %v1220_v54, %v1215_v53  ;;  %v4990_v50 = vld [vmem:[%s5386_s5 + $0x30] sm:$0xff]  ;;  %v4997_v52 = vld [vmem:[%s5386_s5 + $0x28] sm:$0xff]  ;;  %v5004_v53 = vld [vmem:[%s5386_s5 + $0x20] sm:$0xff] }
 0x85b   :  { %v5011_v54 = vld [vmem:[%s5386_s5 + $0x18] sm:$0xff] }
 0x85c   :  { %v4909_v59 = vadd.f32 %v1225_v3, %v1213_v62  ;;  %1237 = vrot.lane.b32.xlu0 %v4906_v57, %s4407_s1  ;;  %v5025_v62 = vld [vmem:[%s5386_s5 + $0x8] sm:$0xff]  ;;  %v5032_v3 = vld [vmem:[%s5386_s5] sm:$0xff] }
 0x85e   :  { %1235 = vrot.lane.b32.xlu1 %v4909_v59, %s4407_s1 }
 0x8ce   :  { %v1238_v58 = vpop.permute.xlu0 %1237 }
 0x8cf   :  { %3935 = vmatprep.subr.mxu0 %v1238_v58 }
 0x8d0   :  { %3936 = vmatpush3.msra.mxu0 %v1238_v58  ;;  %v1236_v56 = vpop.permute.xlu1 %1235 }
 0x8d1   :  { %3937 = vmatprep.subr.mxu0 %v1236_v56 }
 0x8d2   :  { %3938 = vmatpush3.msra.mxu0 %v1236_v56 }
 0x8d3   :  { %3940 = vmatmul.mubr.msk.f32.vlgmr.msra.gmra.mxu0 %vm516_vm1, %v4554_v20  ;;  %3942 = vmatprep.subr.mxu0 %v4561_v21 }
 0x8d4   :  { %3943 = vmatpush3.msra.mxu0 %v4561_v21 }
 0x8d5   :  { %3944 = vmatprep.subr.mxu0 %v4568_v22 }
 0x8d6   :  { %3945 = vmatpush3.msra.mxu0 %v4568_v22 }
 0x8d7   :  { %3946 = vmatprep.subr.mxu0 %v4575_v23 }
 0x8d8   :  { %3947 = vmatpush3.msra.mxu0 %v4575_v23 }
 0x8d9   :  { %3948 = vmatprep.subr.mxu0 %v4582_v24 }
 0x8da   :  { %3949 = vmatpush3.msra.mxu0 %v4582_v24 }
 0x8db   :  { %3950 = vmatprep.subr.mxu0 %v4589_v25 }
 0x8dc   :  { %3951 = vmatpush3.msra.mxu0 %v4589_v25 }
 0x8dd   :  { %3952 = vmatprep.subr.mxu0 %v4596_v26 }
 0x8de   :  { %3953 = vmatpush3.msra.mxu0 %v4596_v26 }
 0x8df   :  { %3954 = vmatprep.subr.mxu0 %v4603_v27 }
 0x8e0   :  { %3955 = vmatpush3.msra.mxu0 %v4603_v27 }
 0x8e1   :  { %3956 = vmatprep.subr.mxu0 %v4610_v28 }
 0x8e2   :  { %3957 = vmatpush3.msra.mxu0 %v4610_v28 }
 0x993   :  { %v3941_v21 = vpop.f32.mrf.mxu0 }
 0x995   :  { %v1307_v22 = vpop.f32.mrf.mxu0 }
 0x996   :  { %3958 = vmatprep.mubr.msk.f32.mxu0 %vm462_vm2, %v1307_v22 }
 0x997   :  { %3959 = vmatmul.mubr.msk.f32.vlgmr.msra.gmra.mxu0 %vm462_vm2, %v3941_v21 }
 0x998   :  { %3991 = vmatprep.mubr.msk.f32.mxu0 %vm516_vm1, %v4546_v19 }
 0xa57   :  { %v3960_v23 = vpop.f32.mrf.mxu0 }
 0xa58   :  { %v1398_v24 = vadd.f32 %v3960_v23, %v4807_v30  ;;  %v1232_v30 = vld [vmem:[#allocation2 + $0x58] sm:$0xff] }
 0xa59   :  { %v1388_v25 = vpop.f32.mrf.mxu0 }
 0xa5a   :  { %v3543_v26 = vmul.f32 -1.442695, %v1398_v24  ;;  %v1397_v27 = vadd.f32 %v1388_v25, %v4802_v16 }
 0xa5c   :  { %4293 = vpow2.f32 %v3543_v26  ;;  %v3542_v1 = vmul.f32 -1.442695, %v1397_v27 }
 0xa5e   :  { %4295 = vpow2.f32 %v3542_v1 }
 0xa69   :  { %v4294_v28 = vpop.eup %4293 }
 0xa6a   :  { %v1406_v60 = vadd.f32 1.0, %v4294_v28 }
 0xa6b   :  { %v4296_v61 = vpop.eup %4295 }
 0xa6c   :  { %4297 = vrcp.f32 %v1406_v60  ;;  %v1405_v5 = vadd.f32 1.0, %v4296_v61 }
 0xa6e   :  { %4299 = vrcp.f32 %v1405_v5 }
 0xa79   :  { %v4298_v11 = vpop.eup %4297 }
 0xa7a   :  { %v1412_v14 = vmul.f32 %v4298_v11, %v1238_v58  ;;  %v1576_v37 = vsub.f32 1.0, %v4298_v11  ;;  %v1574_v8 = vmul.f32 %v4298_v11, %v4906_v57  ;;  %v5018_v57 = vld [vmem:[%s5386_s5 + $0x10] sm:$0xff] }
 0xa7b   :  { %v4300_v15 = vpop.eup %4299 }
 0xa7c   :  { %3961 = vmatprep.subr.mxu1 %v1412_v14  ;;  %v1411_v17 = vmul.f32 %v4300_v15, %v1236_v56  ;;  %v1573_v44 = vmul.f32 %v4300_v15, %v4909_v59  ;;  %v5041_v56 = vld [vmem:[%s5385_s4] sm:$0xff] }
 0xa7d   :  { %3962 = vmatpush3.msra.mxu1 %v1412_v14 }
 0xa7e   :  { %3963 = vmatprep.subr.mxu1 %v1411_v17 }
 0xa7f   :  { %3964 = vmatpush3.msra.mxu1 %v1411_v17 }
 0xa80   :  { %3966 = vmatmul.mubr.msk.f32.vlgmr.msra.gmra.mxu1 %vm516_vm1, %v4554_v20  ;;  %3968 = vmatprep.subr.mxu1 %v4638_v2 }
 0xa81   :  { %3969 = vmatpush3.msra.mxu1 %v4638_v2 }
 0xa82   :  { %3970 = vmatprep.subr.mxu1 %v4646_v4 }
 0xa83   :  { %3971 = vmatpush3.msra.mxu1 %v4646_v4 }
 0xa84   :  { %3972 = vmatprep.subr.mxu1 %v4657_v6 }
 0xa85   :  { %3973 = vmatpush3.msra.mxu1 %v4657_v6 }
 0xa86   :  { %3974 = vmatprep.subr.mxu1 %v4664_v7 }
 0xa87   :  { %3975 = vmatpush3.msra.mxu1 %v4664_v7 }
 0xa88   :  { %3976 = vmatprep.subr.mxu1 %v4675_v9 }
 0xa89   :  { %3977 = vmatpush3.msra.mxu1 %v4675_v9 }
 0xa8a   :  { %3978 = vmatprep.subr.mxu1 %v4682_v10 }
 0xa8b   :  { %3979 = vmatpush3.msra.mxu1 %v4682_v10 }
 0xa8c   :  { %3980 = vmatprep.subr.mxu1 %v4693_v12 }
 0xa8d   :  { %3981 = vmatpush3.msra.mxu1 %v4693_v12 }
 0xa8e   :  { %3982 = vmatprep.subr.mxu1 %v4700_v13 }
 0xa8f   :  { %3983 = vmatpush3.msra.mxu1 %v4700_v13 }
 0xb40   :  { %v3967_v20 = vpop.f32.mrf.mxu1 }
 0xb42   :  { %v1479_v16 = vpop.f32.mrf.mxu1 }
 0xb43   :  { %3984 = vmatprep.mubr.msk.f32.mxu1 %vm462_vm2, %v1479_v16 }
 0xb44   :  { %3985 = vmatmul.mubr.msk.f32.vlgmr.msra.gmra.mxu1 %vm462_vm2, %v3967_v20 }
 0xb45   :  { %4017 = vmatprep.mubr.msk.f32.mxu1 %vm516_vm1, %v4546_v19  ;;  %v1575_v19 = vsub.f32 1.0, %v4300_v15 }
 0xc04   :  { %v3986_v18 = vpop.f32.mrf.mxu1 }
 0xc05   :  { %v1570_v29 = vadd.f32 %v3986_v18, %v1232_v30 }
 0xc06   :  { %v1560_v32 = vpop.f32.mrf.mxu1 }
 0xc07   :  { %4301 = vtanh.f32 %v1570_v29  ;;  %v1569_v33 = vadd.f32 %v1560_v32, %v1230_v31 }
 0xc09   :  { %4303 = vtanh.f32 %v1569_v33 }
 0xc14   :  { %v4302_v35 = vpop.eup %4301 }
 0xc15   :  { %1581 = vrot.lane.b32.xlu0 %v4302_v35, %s4407_s1 }
 0xc16   :  { %v4304_v36 = vpop.eup %4303 }
 0xc17   :  { %1579 = vrot.lane.b32.xlu1 %v4304_v36, %s4407_s1 }
 0xc87   :  { %v1582_v63 = vpop.permute.xlu0 %1581 }
 0xc88   :  { %v1586_v39 = vmul.f32 %v1582_v63, %v1576_v37 }
 0xc89   :  { %v1580_v42 = vpop.permute.xlu1 %1579 }
 0xc8a   :  { %v4964_v0 = vadd.f32 %v1586_v39, %v1574_v8  ;;  %v1585_v45 = vmul.f32 %v1580_v42, %v1575_v19 }
 0xc8c   :  { %v4967_v46 = vadd.f32 %v1585_v45, %v1573_v44  ;;  %1597 = vrot.lane.b32.xlu0 %v4964_v0, %s4407_s1 }
 0xc8e   :  { %1595 = vrot.lane.b32.xlu1 %v4967_v46, %s4407_s1 }
 0xcfe   :  { %v1598_v40 = vpop.permute.xlu0 %1597 }
 0xcff   :  { %3987 = vmatprep.subr.mxu0 %v1598_v40 }
 0xd00   :  { %3988 = vmatpush3.msra.mxu0 %v1598_v40  ;;  %v1596_v48 = vpop.permute.xlu1 %1595 }
 0xd01   :  { %3989 = vmatprep.subr.mxu0 %v1596_v48 }
 0xd02   :  { %3990 = vmatpush3.msra.mxu0 %v1596_v48 }
 0xd03   :  { %3992 = vmatmul.mubr.msk.f32.vlgmr.msra.gmra.mxu0 %vm516_vm1, %v4976_v41  ;;  %3994 = vmatprep.subr.mxu0 %v4983_v49 }
 0xd04   :  { %3995 = vmatpush3.msra.mxu0 %v4983_v49 }
 0xd05   :  { %3996 = vmatprep.subr.mxu0 %v4990_v50 }
 0xd06   :  { %3997 = vmatpush3.msra.mxu0 %v4990_v50 }
 0xd07   :  { %3998 = vmatprep.subr.mxu0 %v4997_v52 }
 0xd08   :  { %3999 = vmatpush3.msra.mxu0 %v4997_v52 }
 0xd09   :  { %4000 = vmatprep.subr.mxu0 %v5004_v53 }
 0xd0a   :  { %4001 = vmatpush3.msra.mxu0 %v5004_v53 }
 0xd0b   :  { %4002 = vmatprep.subr.mxu0 %v5011_v54 }
 0xd0c   :  { %4003 = vmatpush3.msra.mxu0 %v5011_v54 }
 0xd0d   :  { %4004 = vmatprep.subr.mxu0 %v5018_v57 }
 0xd0e   :  { %4005 = vmatpush3.msra.mxu0 %v5018_v57 }
 0xd0f   :  { %4006 = vmatprep.subr.mxu0 %v5025_v62 }
 0xd10   :  { %4007 = vmatpush3.msra.mxu0 %v5025_v62 }
 0xd11   :  { %4008 = vmatprep.subr.mxu0 %v5032_v3 }
 0xd12   :  { %4009 = vmatpush3.msra.mxu0 %v5032_v3 }
 0xdc3   :  { %v3993_v59 = vpop.f32.mrf.mxu0 }
 0xdc5   :  { %v1667_v58 = vpop.f32.mrf.mxu0 }
 0xdc6   :  { %4010 = vmatprep.mubr.msk.f32.mxu0 %vm462_vm2, %v1667_v58 }
 0xdc7   :  { %4011 = vmatmul.mubr.msk.f32.vlgmr.msra.gmra.mxu0 %vm462_vm2, %v3993_v59 }
 0xdc8   :  { %4043 = vmatprep.mubr.msk.f32.mxu0 %vm516_vm1, %v5041_v56 }
 0xe87   :  { %v4012_v21 = vpop.f32.mrf.mxu0 }
 0xe88   :  { %v1758_v22 = vadd.f32 %v4012_v21, %v4817_v38 }
 0xe89   :  { %v1748_v23 = vpop.f32.mrf.mxu0 }
 0xe8a   :  { %v3553_v24 = vmul.f32 -1.442695, %v1758_v22  ;;  %v1757_v25 = vadd.f32 %v1748_v23, %v4812_v34  ;;  %v5124_v23 = vld [vmem:[%s5387_s6 + $0x28] sm:$0xff] }
 0xe8c   :  { %4305 = vpow2.f32 %v3553_v24  ;;  %v3552_v26 = vmul.f32 -1.442695, %v1757_v25  ;;  %v5131_v24 = vld [vmem:[%s5387_s6 + $0x20] sm:$0xff]  ;;  %v5138_v25 = vld [vmem:[%s5387_s6 + $0x18] sm:$0xff] }
 0xe8e   :  { %4307 = vpow2.f32 %v3552_v26  ;;  %v5145_v26 = vld [vmem:[%s5387_s6 + $0x10] sm:$0xff] }
 0xe99   :  { %v4306_v27 = vpop.eup %4305 }
 0xe9a   :  { %v1766_v1 = vadd.f32 1.0, %v4306_v27  ;;  %v5152_v27 = vld [vmem:[%s5387_s6 + $0x8] sm:$0xff] }
 0xe9b   :  { %v4308_v28 = vpop.eup %4307 }
 0xe9c   :  { %4309 = vrcp.f32 %v1766_v1  ;;  %v1765_v60 = vadd.f32 1.0, %v4308_v28  ;;  %v5159_v1 = vld [vmem:[%s5387_s6] sm:$0xff] }
 0xe9e   :  { %4311 = vrcp.f32 %v1765_v60 }
 0xea9   :  { %v4310_v61 = vpop.eup %4309 }
 0xeaa   :  { %v1772_v5 = vmul.f32 %v4310_v61, %v1598_v40  ;;  %v1936_v15 = vsub.f32 1.0, %v4310_v61  ;;  %v1934_v20 = vmul.f32 %v4310_v61, %v4964_v0  ;;  %v1952_v61 = vld [vmem:[#allocation2 + $0x98] sm:$0xff] }
 0xeab   :  { %v4312_v11 = vpop.eup %4311 }
 0xeac   :  { %4013 = vmatprep.subr.mxu1 %v1772_v5  ;;  %v1771_v14 = vmul.f32 %v4312_v11, %v1596_v48  ;;  %v1935_v30 = vsub.f32 1.0, %v4312_v11  ;;  %v1933_v31 = vmul.f32 %v4312_v11, %v4967_v46 }
 0xead   :  { %4014 = vmatpush3.msra.mxu1 %v1772_v5 }
 0xeae   :  { %4015 = vmatprep.subr.mxu1 %v1771_v14 }
 0xeaf   :  { %4016 = vmatpush3.msra.mxu1 %v1771_v14  ;;  %v1950_v14 = vld [vmem:[#allocation2 + $0x88] sm:$0xff] }
 0xeb0   :  { %4018 = vmatmul.mubr.msk.f32.vlgmr.msra.gmra.mxu1 %vm516_vm1, %v4976_v41  ;;  %4020 = vmatprep.subr.mxu1 %v4638_v2 }
 0xeb1   :  { %4021 = vmatpush3.msra.mxu1 %v4638_v2 }
 0xeb2   :  { %4022 = vmatprep.subr.mxu1 %v4646_v4 }
 0xeb3   :  { %4023 = vmatpush3.msra.mxu1 %v4646_v4 }
 0xeb4   :  { %4024 = vmatprep.subr.mxu1 %v4657_v6 }
 0xeb5   :  { %4025 = vmatpush3.msra.mxu1 %v4657_v6  ;;  %v1592_v6 = vld [vmem:[#allocation2 + $0x78] sm:$0xff] }
 0xeb6   :  { %4026 = vmatprep.subr.mxu1 %v4664_v7 }
 0xeb7   :  { %4027 = vmatpush3.msra.mxu1 %v4664_v7 }
 0xeb8   :  { %4028 = vmatprep.subr.mxu1 %v4675_v9 }
 0xeb9   :  { %4029 = vmatpush3.msra.mxu1 %v4675_v9 }
 0xeba   :  { %4030 = vmatprep.subr.mxu1 %v4682_v10 }
 0xebb   :  { %4031 = vmatpush3.msra.mxu1 %v4682_v10  ;;  %v1590_v10 = vld [vmem:[#allocation2 + $0x68] sm:$0xff] }
 0xebc   :  { %4032 = vmatprep.subr.mxu1 %v4693_v12 }
 0xebd   :  { %4033 = vmatpush3.msra.mxu1 %v4693_v12 }
 0xebe   :  { %4034 = vmatprep.subr.mxu1 %v4700_v13 }
 0xebf   :  { %4035 = vmatpush3.msra.mxu1 %v4700_v13 }
 0xf70   :  { %v4019_v2 = vpop.f32.mrf.mxu1 }
 0xf72   :  { %v1839_v4 = vpop.f32.mrf.mxu1 }
 0xf73   :  { %4036 = vmatprep.mubr.msk.f32.mxu1 %vm462_vm2, %v1839_v4 }
 0xf74   :  { %4037 = vmatmul.mubr.msk.f32.vlgmr.msra.gmra.mxu1 %vm462_vm2, %v4019_v2 }
 0xf75   :  { %4069 = vmatprep.mubr.msk.f32.mxu1 %vm516_vm1, %v5041_v56 }
0x1034   :  { %v4038_v7 = vpop.f32.mrf.mxu1 }
0x1035   :  { %v1930_v9 = vadd.f32 %v4038_v7, %v1592_v6 }
0x1036   :  { %v1920_v34 = vpop.f32.mrf.mxu1 }
0x1037   :  { %4313 = vtanh.f32 %v1930_v9  ;;  %v1929_v12 = vadd.f32 %v1920_v34, %v1590_v10 }
0x1039   :  { %4315 = vtanh.f32 %v1929_v12 }
0x1044   :  { %v4314_v38 = vpop.eup %4313 }
0x1045   :  { %1941 = vrot.lane.b32.xlu0 %v4314_v38, %s4407_s1 }
0x1046   :  { %v4316_v13 = vpop.eup %4315 }
0x1047   :  { %1939 = vrot.lane.b32.xlu1 %v4316_v13, %s4407_s1 }
0x10b7   :  { %v1942_v17 = vpop.permute.xlu0 %1941 }
0x10b8   :  { %v1946_v16 = vmul.f32 %v1942_v17, %v1936_v15 }
0x10b9   :  { %v1940_v18 = vpop.permute.xlu1 %1939 }
0x10ba   :  { %v5072_v29 = vadd.f32 %v1946_v16, %v1934_v20  ;;  %v1945_v32 = vmul.f32 %v1940_v18, %v1935_v30 }
0x10bc   :  { %v5075_v33 = vadd.f32 %v1945_v32, %v1933_v31  ;;  %1957 = vrot.lane.b32.xlu0 %v5072_v29, %s4407_s1 }
0x10be   :  { %1955 = vrot.lane.b32.xlu1 %v5075_v33, %s4407_s1 }
0x112e   :  { %v1958_v35 = vpop.permute.xlu0 %1957 }
0x112f   :  { %4039 = vmatprep.subr.mxu0 %v1958_v35 }
0x1130   :  { %4040 = vmatpush3.msra.mxu0 %v1958_v35  ;;  %v1956_v36 = vpop.permute.xlu1 %1955 }
0x1131   :  { %4041 = vmatprep.subr.mxu0 %v1956_v36 }
0x1132   :  { %4042 = vmatpush3.msra.mxu0 %v1956_v36 }
0x1133   :  { %4044 = vmatmul.mubr.msk.f32.vlgmr.msra.gmra.mxu0 %vm516_vm1, %v4976_v41  ;;  %4046 = vmatprep.subr.mxu0 %v4983_v49 }
0x1134   :  { %4047 = vmatpush3.msra.mxu0 %v4983_v49 }
0x1135   :  { %4048 = vmatprep.subr.mxu0 %v4990_v50 }
0x1136   :  { %4049 = vmatpush3.msra.mxu0 %v4990_v50 }
0x1137   :  { %4050 = vmatprep.subr.mxu0 %v4997_v52 }
0x1138   :  { %4051 = vmatpush3.msra.mxu0 %v4997_v52 }
0x1139   :  { %4052 = vmatprep.subr.mxu0 %v5004_v53 }
0x113a   :  { %4053 = vmatpush3.msra.mxu0 %v5004_v53 }
0x113b   :  { %4054 = vmatprep.subr.mxu0 %v5011_v54 }
0x113c   :  { %4055 = vmatpush3.msra.mxu0 %v5011_v54 }
0x113d   :  { %4056 = vmatprep.subr.mxu0 %v5018_v57 }
0x113e   :  { %4057 = vmatpush3.msra.mxu0 %v5018_v57 }
0x113f   :  { %4058 = vmatprep.subr.mxu0 %v5025_v62 }
0x1140   :  { %4059 = vmatpush3.msra.mxu0 %v5025_v62 }
0x1141   :  { %4060 = vmatprep.subr.mxu0 %v5032_v3 }
0x1142   :  { %4061 = vmatpush3.msra.mxu0 %v5032_v3 }
0x11f3   :  { %v4045_v37 = vpop.f32.mrf.mxu0 }
0x11f5   :  { %v2027_v63 = vpop.f32.mrf.mxu0 }
0x11f6   :  { %4062 = vmatprep.mubr.msk.f32.mxu0 %vm462_vm2, %v2027_v63 }
0x11f7   :  { %4063 = vmatmul.mubr.msk.f32.vlgmr.msra.gmra.mxu0 %vm462_vm2, %v4045_v37 }
0x11f8   :  { %4095 = vmatprep.mubr.msk.f32.mxu0 %vm516_vm1, %v5041_v56 }
0x12b7   :  { %v4064_v8 = vpop.f32.mrf.mxu0 }
0x12b8   :  { %v2118_v39 = vadd.f32 %v4064_v8, %v4827_v47  ;;  %v5117_v47 = vld [vmem:[%s5387_s6 + $0x30] sm:$0xff] }
0x12b9   :  { %v2108_v19 = vpop.f32.mrf.mxu0 }
0x12ba   :  { %v3563_v42 = vmul.f32 -1.442695, %v2118_v39  ;;  %v2117_v0 = vadd.f32 %v2108_v19, %v4822_v43  ;;  %v5110_v43 = vld [vmem:[%s5387_s6 + $0x38] sm:$0xff] }
0x12bc   :  { %4317 = vpow2.f32 %v3563_v42  ;;  %v3562_v44 = vmul.f32 -1.442695, %v2117_v0 }
0x12be   :  { %4319 = vpow2.f32 %v3562_v44 }
0x12c9   :  { %v4318_v45 = vpop.eup %4317 }
0x12ca   :  { %v2126_v46 = vadd.f32 1.0, %v4318_v45 }
0x12cb   :  { %v4320_v40 = vpop.eup %4319 }
0x12cc   :  { %4321 = vrcp.f32 %v2126_v46  ;;  %v2125_v48 = vadd.f32 1.0, %v4320_v40  ;;  %v2312_v40 = vld [vmem:[#allocation2 + $0xb8] sm:$0xff] }
0x12ce   :  { %4323 = vrcp.f32 %v2125_v48 }
0x12d9   :  { %v4322_v59 = vpop.eup %4321 }
0x12da   :  { %v2132_v58 = vmul.f32 %v4322_v59, %v1958_v35  ;;  %v2296_v9 = vsub.f32 1.0, %v4322_v59  ;;  %v2294_v34 = vmul.f32 %v4322_v59, %v5072_v29 }
0x12db   :  { %v4324_v21 = vpop.eup %4323 }
0x12dc   :  { %4065 = vmatprep.subr.mxu1 %v2132_v58  ;;  %v2131_v22 = vmul.f32 %v4324_v21, %v1956_v36  ;;  %v2295_v38 = vsub.f32 1.0, %v4324_v21  ;;  %v2293_v17 = vmul.f32 %v4324_v21, %v5075_v33 }
0x12dd   :  { %4066 = vmatpush3.msra.mxu1 %v2132_v58  ;;  %v2310_v58 = vld [vmem:[#allocation2 + $0xa8] sm:$0xff] }
0x12de   :  { %4067 = vmatprep.subr.mxu1 %v2131_v22 }
0x12df   :  { %4068 = vmatpush3.msra.mxu1 %v2131_v22 }
0x12e0   :  { %4070 = vmatmul.mubr.msk.f32.vlgmr.msra.gmra.mxu1 %vm516_vm1, %v4976_v41  ;;  %4072 = vmatprep.subr.mxu1 %v5110_v43 }
0x12e1   :  { %4073 = vmatpush3.msra.mxu1 %v5110_v43 }
0x12e2   :  { %4074 = vmatprep.subr.mxu1 %v5117_v47 }
0x12e3   :  { %4075 = vmatpush3.msra.mxu1 %v5117_v47 }
0x12e4   :  { %4076 = vmatprep.subr.mxu1 %v5124_v23 }
0x12e5   :  { %4077 = vmatpush3.msra.mxu1 %v5124_v23 }
0x12e6   :  { %4078 = vmatprep.subr.mxu1 %v5131_v24 }
0x12e7   :  { %4079 = vmatpush3.msra.mxu1 %v5131_v24 }
0x12e8   :  { %4080 = vmatprep.subr.mxu1 %v5138_v25 }
0x12e9   :  { %4081 = vmatpush3.msra.mxu1 %v5138_v25 }
0x12ea   :  { %4082 = vmatprep.subr.mxu1 %v5145_v26 }
0x12eb   :  { %4083 = vmatpush3.msra.mxu1 %v5145_v26 }
0x12ec   :  { %4084 = vmatprep.subr.mxu1 %v5152_v27 }
0x12ed   :  { %4085 = vmatpush3.msra.mxu1 %v5152_v27 }
0x12ee   :  { %4086 = vmatprep.subr.mxu1 %v5159_v1 }
0x12ef   :  { %4087 = vmatpush3.msra.mxu1 %v5159_v1 }
0x13a0   :  { %v4071_v28 = vpop.f32.mrf.mxu1 }
0x13a2   :  { %v2199_v60 = vpop.f32.mrf.mxu1 }
0x13a3   :  { %4088 = vmatprep.mubr.msk.f32.mxu1 %vm462_vm2, %v2199_v60 }
0x13a4   :  { %4089 = vmatmul.mubr.msk.f32.vlgmr.msra.gmra.mxu1 %vm462_vm2, %v4071_v28 }
0x13a5   :  { %4121 = vmatprep.mubr.msk.f32.mxu1 %vm516_vm1, %v5041_v56 }
0x1464   :  { %v4090_v5 = vpop.f32.mrf.mxu1 }
0x1465   :  { %v2290_v11 = vadd.f32 %v4090_v5, %v1952_v61 }
0x1466   :  { %v2280_v2 = vpop.f32.mrf.mxu1 }
0x1467   :  { %4325 = vtanh.f32 %v2290_v11  ;;  %v2289_v4 = vadd.f32 %v2280_v2, %v1950_v14 }
0x1469   :  { %4327 = vtanh.f32 %v2289_v4 }
0x1474   :  { %v4326_v6 = vpop.eup %4325 }
0x1475   :  { %2301 = vrot.lane.b32.xlu0 %v4326_v6, %s4407_s1 }
0x1476   :  { %v4328_v7 = vpop.eup %4327 }
0x1477   :  { %2299 = vrot.lane.b32.xlu1 %v4328_v7, %s4407_s1 }
0x14e7   :  { %v2302_v10 = vpop.permute.xlu0 %2301 }
0x14e8   :  { %v2306_v12 = vmul.f32 %v2302_v10, %v2296_v9 }
0x14e9   :  { %v2300_v13 = vpop.permute.xlu1 %2299 }
0x14ea   :  { %v5170_v15 = vadd.f32 %v2306_v12, %v2294_v34  ;;  %v2305_v20 = vmul.f32 %v2300_v13, %v2295_v38 }
0x14ec   :  { %v5173_v16 = vadd.f32 %v2305_v20, %v2293_v17  ;;  %2317 = vrot.lane.b32.xlu0 %v5170_v15, %s4407_s1 }
0x14ee   :  { %2315 = vrot.lane.b32.xlu1 %v5173_v16, %s4407_s1 }
0x155e   :  { %v2318_v30 = vpop.permute.xlu0 %2317 }
0x155f   :  { %4091 = vmatprep.subr.mxu0 %v2318_v30 }
0x1560   :  { %4092 = vmatpush3.msra.mxu0 %v2318_v30  ;;  %v2316_v18 = vpop.permute.xlu1 %2315 }
0x1561   :  { %4093 = vmatprep.subr.mxu0 %v2316_v18 }
0x1562   :  { %4094 = vmatpush3.msra.mxu0 %v2316_v18 }
0x1563   :  { %4096 = vmatmul.mubr.msk.f32.vlgmr.msra.gmra.mxu0 %vm516_vm1, %v4976_v41  ;;  %4098 = vmatprep.subr.mxu0 %v4983_v49 }
0x1564   :  { %4099 = vmatpush3.msra.mxu0 %v4983_v49 }
0x1565   :  { %4100 = vmatprep.subr.mxu0 %v4990_v50 }
0x1566   :  { %4101 = vmatpush3.msra.mxu0 %v4990_v50 }
0x1567   :  { %4102 = vmatprep.subr.mxu0 %v4997_v52 }
0x1568   :  { %4103 = vmatpush3.msra.mxu0 %v4997_v52 }
0x1569   :  { %4104 = vmatprep.subr.mxu0 %v5004_v53 }
0x156a   :  { %4105 = vmatpush3.msra.mxu0 %v5004_v53 }
0x156b   :  { %4106 = vmatprep.subr.mxu0 %v5011_v54 }
0x156c   :  { %4107 = vmatpush3.msra.mxu0 %v5011_v54 }
0x156d   :  { %4108 = vmatprep.subr.mxu0 %v5018_v57 }
0x156e   :  { %4109 = vmatpush3.msra.mxu0 %v5018_v57 }
0x156f   :  { %4110 = vmatprep.subr.mxu0 %v5025_v62 }
0x1570   :  { %4111 = vmatpush3.msra.mxu0 %v5025_v62 }
0x1571   :  { %4112 = vmatprep.subr.mxu0 %v5032_v3 }
0x1572   :  { %4113 = vmatpush3.msra.mxu0 %v5032_v3 }
0x1623   :  { %v4097_v29 = vpop.f32.mrf.mxu0 }
0x1625   :  { %v2387_v31 = vpop.f32.mrf.mxu0 }
0x1626   :  { %4114 = vmatprep.mubr.msk.f32.mxu0 %vm462_vm2, %v2387_v31 }
0x1627   :  { %4115 = vmatmul.mubr.msk.f32.vlgmr.msra.gmra.mxu0 %vm462_vm2, %v4097_v29 }
0x1628   :  { %4147 = vmatprep.mubr.msk.f32.mxu0 %vm516_vm1, %v5041_v56 }
0x16e7   :  { %v4116_v32 = vpop.f32.mrf.mxu0 }
0x16e8   :  { %v2478_v33 = vadd.f32 %v4116_v32, %v4837_v55 }
0x16e9   :  { %v2468_v35 = vpop.f32.mrf.mxu0 }
0x16ea   :  { %v3573_v36 = vmul.f32 -1.442695, %v2478_v33  ;;  %v2477_v37 = vadd.f32 %v2468_v35, %v4832_v51 }
0x16ec   :  { %4329 = vpow2.f32 %v3573_v36  ;;  %v3572_v63 = vmul.f32 -1.442695, %v2477_v37 }
0x16ee   :  { %4331 = vpow2.f32 %v3572_v63 }
0x16f9   :  { %v4330_v8 = vpop.eup %4329 }
0x16fa   :  { %v2486_v39 = vadd.f32 1.0, %v4330_v8 }
0x16fb   :  { %v4332_v19 = vpop.eup %4331 }
0x16fc   :  { %4333 = vrcp.f32 %v2486_v39  ;;  %v2485_v42 = vadd.f32 1.0, %v4332_v19 }
0x16fe   :  { %4335 = vrcp.f32 %v2485_v42 }
0x1709   :  { %v4334_v0 = vpop.eup %4333 }
0x170a   :  { %v2492_v44 = vmul.f32 %v4334_v0, %v2318_v30  ;;  %v2656_v61 = vsub.f32 1.0, %v4334_v0  ;;  %v2654_v11 = vmul.f32 %v4334_v0, %v5170_v15  ;;  %v2671_v15 = vld [vmem:[#allocation2 + $0xd0] sm:$0xff]  ;;  %v2672_v0 = vld [vmem:[#allocation2 + $0xd8] sm:$0xff] }
0x170b   :  { %v4336_v45 = vpop.eup %4335 }
0x170c   :  { %4117 = vmatprep.subr.mxu1 %v2492_v44  ;;  %v2491_v46 = vmul.f32 %v4336_v45, %v2316_v18  ;;  %v2655_v2 = vsub.f32 1.0, %v4336_v45  ;;  %v2653_v7 = vmul.f32 %v4336_v45, %v5173_v16  ;;  %v2669_v16 = vld [vmem:[#allocation2 + $0xc0] sm:$0xff] }
0x170d   :  { %4118 = vmatpush3.msra.mxu1 %v2492_v44 }
0x170e   :  { %4119 = vmatprep.subr.mxu1 %v2491_v46 }
0x170f   :  { %4120 = vmatpush3.msra.mxu1 %v2491_v46  ;;  %v2670_v46 = vld [vmem:[#allocation2 + $0xc8] sm:$0xff] }
0x1710   :  { %4122 = vmatmul.mubr.msk.f32.vlgmr.msra.gmra.mxu1 %vm516_vm1, %v4976_v41  ;;  %4124 = vmatprep.subr.mxu1 %v5110_v43 }
0x1711   :  { %4125 = vmatpush3.msra.mxu1 %v5110_v43 }
0x1712   :  { %4126 = vmatprep.subr.mxu1 %v5117_v47 }
0x1713   :  { %4127 = vmatpush3.msra.mxu1 %v5117_v47 }
0x1714   :  { %4128 = vmatprep.subr.mxu1 %v5124_v23 }
0x1715   :  { %4129 = vmatpush3.msra.mxu1 %v5124_v23 }
0x1716   :  { %4130 = vmatprep.subr.mxu1 %v5131_v24 }
0x1717   :  { %4131 = vmatpush3.msra.mxu1 %v5131_v24 }
0x1718   :  { %4132 = vmatprep.subr.mxu1 %v5138_v25 }
0x1719   :  { %4133 = vmatpush3.msra.mxu1 %v5138_v25 }
0x171a   :  { %4134 = vmatprep.subr.mxu1 %v5145_v26 }
0x171b   :  { %4135 = vmatpush3.msra.mxu1 %v5145_v26 }
0x171c   :  { %4136 = vmatprep.subr.mxu1 %v5152_v27 }
0x171d   :  { %4137 = vmatpush3.msra.mxu1 %v5152_v27 }
0x171e   :  { %4138 = vmatprep.subr.mxu1 %v5159_v1 }
0x171f   :  { %4139 = vmatpush3.msra.mxu1 %v5159_v1 }
0x17d0   :  { %v4123_v51 = vpop.f32.mrf.mxu1 }
0x17d2   :  { %v2559_v55 = vpop.f32.mrf.mxu1 }
0x17d3   :  { %4140 = vmatprep.mubr.msk.f32.mxu1 %vm462_vm2, %v2559_v55 }
0x17d4   :  { %4141 = vmatmul.mubr.msk.f32.vlgmr.msra.gmra.mxu1 %vm462_vm2, %v4123_v51 }
0x17d5   :  { %4173 = vmatprep.mubr.msk.f32.mxu1 %vm516_vm1, %v5041_v56 }
0x1894   :  { %v4142_v48 = vpop.f32.mrf.mxu1 }
0x1895   :  { %v2650_v59 = vadd.f32 %v4142_v48, %v2312_v40 }
0x1896   :  { %v2640_v21 = vpop.f32.mrf.mxu1 }
0x1897   :  { %4337 = vtanh.f32 %v2650_v59  ;;  %v2649_v22 = vadd.f32 %v2640_v21, %v2310_v58 }
0x1899   :  { %4339 = vtanh.f32 %v2649_v22 }
0x18a4   :  { %v4338_v28 = vpop.eup %4337 }
0x18a5   :  { %2661 = vrot.lane.b32.xlu0 %v4338_v28, %s4407_s1 }
0x18a6   :  { %v4340_v60 = vpop.eup %4339 }
0x18a7   :  { %2659 = vrot.lane.b32.xlu1 %v4340_v60, %s4407_s1 }
0x1917   :  { %v2662_v5 = vpop.permute.xlu0 %2661 }
0x1918   :  { %v2666_v14 = vmul.f32 %v2662_v5, %v2656_v61 }
0x1919   :  { %v2660_v4 = vpop.permute.xlu1 %2659 }
0x191a   :  { %v5228_v6 = vadd.f32 %v2666_v14, %v2654_v11  ;;  %v2665_v9 = vmul.f32 %v2660_v4, %v2655_v2  ;;  %v3029_v4 = vld [vmem:[#allocation2 + $0xe0] sm:$0xff] }
0x191c   :  { %v5231_v10 = vadd.f32 %v2665_v9, %v2653_v7  ;;  %2677 = vrot.lane.b32.xlu0 %v5228_v6, %s4407_s1 }
0x191e   :  { %2675 = vrot.lane.b32.xlu1 %v5231_v10, %s4407_s1 }
0x198e   :  { %v2678_v34 = vpop.permute.xlu0 %2677 }
0x198f   :  { %4143 = vmatprep.subr.mxu0 %v2678_v34 }
0x1990   :  { %4144 = vmatpush3.msra.mxu0 %v2678_v34  ;;  %v2676_v12 = vpop.permute.xlu1 %2675 }
0x1991   :  { %4145 = vmatprep.subr.mxu0 %v2676_v12 }
0x1992   :  { %4146 = vmatpush3.msra.mxu0 %v2676_v12 }
0x1993   :  { %4148 = vmatmul.mubr.msk.f32.vlgmr.msra.gmra.mxu0 %vm516_vm1, %v4976_v41  ;;  %4150 = vmatprep.subr.mxu0 %v4983_v49 }
0x1994   :  { %4151 = vmatpush3.msra.mxu0 %v4983_v49 }
0x1995   :  { %4152 = vmatprep.subr.mxu0 %v4990_v50 }
0x1996   :  { %4153 = vmatpush3.msra.mxu0 %v4990_v50 }
0x1997   :  { %4154 = vmatprep.subr.mxu0 %v4997_v52 }
0x1998   :  { %4155 = vmatpush3.msra.mxu0 %v4997_v52 }
0x1999   :  { %4156 = vmatprep.subr.mxu0 %v5004_v53 }
0x199a   :  { %4157 = vmatpush3.msra.mxu0 %v5004_v53 }
0x199b   :  { %4158 = vmatprep.subr.mxu0 %v5011_v54 }
0x199c   :  { %4159 = vmatpush3.msra.mxu0 %v5011_v54 }
0x199d   :  { %4160 = vmatprep.subr.mxu0 %v5018_v57 }
0x199e   :  { %4161 = vmatpush3.msra.mxu0 %v5018_v57 }
0x199f   :  { %4162 = vmatprep.subr.mxu0 %v5025_v62 }
0x19a0   :  { %4163 = vmatpush3.msra.mxu0 %v5025_v62 }
0x19a1   :  { %4164 = vmatprep.subr.mxu0 %v5032_v3 }
0x19a2   :  { %4165 = vmatpush3.msra.mxu0 %v5032_v3 }
0x1a53   :  { %v4149_v38 = vpop.f32.mrf.mxu0 }
0x1a55   :  { %v2747_v13 = vpop.f32.mrf.mxu0 }
0x1a56   :  { %4166 = vmatprep.mubr.msk.f32.mxu0 %vm462_vm2, %v2747_v13 }
0x1a57   :  { %4167 = vmatmul.mubr.msk.f32.vlgmr.msra.gmra.mxu0 %vm462_vm2, %v4149_v38 }
0x1a58   :  { %4199 = vmatprep.mubr.msk.f32.mxu0 %vm516_vm1, %v5041_v56 }
0x1b17   :  { %v4168_v17 = vpop.f32.mrf.mxu0 }
0x1b18   :  { %v2838_v20 = vadd.f32 %v4168_v17, %v2671_v15 }
0x1b19   :  { %v2828_v30 = vpop.f32.mrf.mxu0 }
0x1b1a   :  { %v3583_v18 = vmul.f32 -1.442695, %v2838_v20  ;;  %v2837_v29 = vadd.f32 %v2828_v30, %v2669_v16  ;;  %v3394_v20 = vld [vmem:[%s5388_s7 + $0x28] sm:$0xff]  ;;  %v3393_v16 = vld [vmem:[%s5388_s7 + $0x20] sm:$0xff] }
0x1b1c   :  { %4341 = vpow2.f32 %v3583_v18  ;;  %v3582_v31 = vmul.f32 -1.442695, %v2837_v29  ;;  %v3392_v18 = vld [vmem:[%s5388_s7 + $0x18] sm:$0xff] }
0x1b1e   :  { %4343 = vpow2.f32 %v3582_v31  ;;  %v3391_v31 = vld [vmem:[%s5388_s7 + $0x10] sm:$0xff] }
0x1b29   :  { %v4342_v32 = vpop.eup %4341 }
0x1b2a   :  { %v2846_v33 = vadd.f32 1.0, %v4342_v32  ;;  %v3390_v32 = vld [vmem:[%s5388_s7 + $0x8] sm:$0xff] }
0x1b2b   :  { %v4344_v35 = vpop.eup %4343 }
0x1b2c   :  { %4345 = vrcp.f32 %v2846_v33  ;;  %v2845_v36 = vadd.f32 1.0, %v4344_v35  ;;  %v3389_v33 = vld [vmem:[%s5388_s7] sm:$0xff] }
0x1b2e   :  { %4347 = vrcp.f32 %v2845_v36 }
0x1b39   :  { %v4346_v37 = vpop.eup %4345 }
0x1b3a   :  { %v2852_v63 = vmul.f32 %v4346_v37, %v2678_v34  ;;  %v3016_v59 = vsub.f32 1.0, %v4346_v37  ;;  %v3014_v21 = vmul.f32 %v4346_v37, %v5228_v6 }
0x1b3b   :  { %v4348_v8 = vpop.eup %4347 }
0x1b3c   :  { %4169 = vmatprep.subr.mxu1 %v2852_v63  ;;  %v2851_v39 = vmul.f32 %v4348_v8, %v2676_v12  ;;  %v3013_v61 = vmul.f32 %v4348_v8, %v5231_v10 }
0x1b3d   :  { %4170 = vmatpush3.msra.mxu1 %v2852_v63 }
0x1b3e   :  { %4171 = vmatprep.subr.mxu1 %v2851_v39 }
0x1b3f   :  { %4172 = vmatpush3.msra.mxu1 %v2851_v39 }
0x1b40   :  { %4174 = vmatmul.mubr.msk.f32.vlgmr.msra.gmra.mxu1 %vm516_vm1, %v4976_v41  ;;  %4176 = vmatprep.subr.mxu1 %v5110_v43 }
0x1b41   :  { %4177 = vmatpush3.msra.mxu1 %v5110_v43 }
0x1b42   :  { %4178 = vmatprep.subr.mxu1 %v5117_v47 }
0x1b43   :  { %4179 = vmatpush3.msra.mxu1 %v5117_v47 }
0x1b44   :  { %4180 = vmatprep.subr.mxu1 %v5124_v23 }
0x1b45   :  { %4181 = vmatpush3.msra.mxu1 %v5124_v23 }
0x1b46   :  { %4182 = vmatprep.subr.mxu1 %v5131_v24 }
0x1b47   :  { %4183 = vmatpush3.msra.mxu1 %v5131_v24 }
0x1b48   :  { %4184 = vmatprep.subr.mxu1 %v5138_v25 }
0x1b49   :  { %4185 = vmatpush3.msra.mxu1 %v5138_v25 }
0x1b4a   :  { %4186 = vmatprep.subr.mxu1 %v5145_v26 }
0x1b4b   :  { %4187 = vmatpush3.msra.mxu1 %v5145_v26 }
0x1b4c   :  { %4188 = vmatprep.subr.mxu1 %v5152_v27 }
0x1b4d   :  { %4189 = vmatpush3.msra.mxu1 %v5152_v27 }
0x1b4e   :  { %4190 = vmatprep.subr.mxu1 %v5159_v1 }
0x1b4f   :  { %4191 = vmatpush3.msra.mxu1 %v5159_v1 }
0x1c00   :  { %v4175_v19 = vpop.f32.mrf.mxu1 }
0x1c02   :  { %v2919_v42 = vpop.f32.mrf.mxu1 }
0x1c03   :  { %4192 = vmatprep.mubr.msk.f32.mxu1 %vm462_vm2, %v2919_v42 }
0x1c04   :  { %4193 = vmatmul.mubr.msk.f32.vlgmr.msra.gmra.mxu1 %vm462_vm2, %v4175_v19 }
0x1c05   :  { %4225 = vmatprep.mubr.msk.f32.mxu1 %vm516_vm1, %v5041_v56  ;;  %v3015_v56 = vsub.f32 1.0, %v4348_v8 }
0x1cc4   :  { %v4194_v44 = vpop.f32.mrf.mxu1 }
0x1cc5   :  { %v3010_v45 = vadd.f32 %v4194_v44, %v2672_v0 }
0x1cc6   :  { %v3000_v51 = vpop.f32.mrf.mxu1 }
0x1cc7   :  { %4349 = vtanh.f32 %v3010_v45  ;;  %v3009_v55 = vadd.f32 %v3000_v51, %v2670_v46 }
0x1cc9   :  { %4351 = vtanh.f32 %v3009_v55 }
0x1cd4   :  { %v4350_v40 = vpop.eup %4349 }
0x1cd5   :  { %3021 = vrot.lane.b32.xlu0 %v4350_v40, %s4407_s1 }
0x1cd6   :  { %v4352_v48 = vpop.eup %4351 }
0x1cd7   :  { %3019 = vrot.lane.b32.xlu1 %v4352_v48, %s4407_s1 }
0x1d47   :  { %v3022_v58 = vpop.permute.xlu0 %3021 }
0x1d48   :  { %v3026_v22 = vmul.f32 %v3022_v58, %v3016_v59 }
0x1d49   :  { %v3020_v28 = vpop.permute.xlu1 %3019 }
0x1d4a   :  { %v5284_v60 = vadd.f32 %v3026_v22, %v3014_v21  ;;  %v3025_v5 = vmul.f32 %v3020_v28, %v3015_v56 }
0x1d4c   :  { %v5287_v11 = vadd.f32 %v3025_v5, %v3013_v61  ;;  %3037 = vrot.lane.b32.xlu0 %v5284_v60, %s4407_s1  ;;  %v3493_v61 = vld [vmem:[%s5389_s8] sm:$0x1] }
0x1d4e   :  { %3035 = vrot.lane.b32.xlu1 %v5287_v11, %s4407_s1 }
0x1dbe   :  { %v3038_v14 = vpop.permute.xlu0 %3037 }
0x1dbf   :  { %4195 = vmatprep.subr.mxu0 %v3038_v14 }
0x1dc0   :  { %4196 = vmatpush3.msra.mxu0 %v3038_v14  ;;  %v3036_v2 = vpop.permute.xlu1 %3035 }
0x1dc1   :  { %4197 = vmatprep.subr.mxu0 %v3036_v2 }
0x1dc2   :  { %4198 = vmatpush3.msra.mxu0 %v3036_v2 }
0x1dc3   :  { %4200 = vmatmul.mubr.msk.f32.vlgmr.msra.gmra.mxu0 %vm516_vm1, %v4976_v41  ;;  %4202 = vmatprep.subr.mxu0 %v4983_v49 }
0x1dc4   :  { %4203 = vmatpush3.msra.mxu0 %v4983_v49 }
0x1dc5   :  { %4204 = vmatprep.subr.mxu0 %v4990_v50 }
0x1dc6   :  { %4205 = vmatpush3.msra.mxu0 %v4990_v50 }
0x1dc7   :  { %4206 = vmatprep.subr.mxu0 %v4997_v52 }
0x1dc8   :  { %4207 = vmatpush3.msra.mxu0 %v4997_v52  ;;  %v3031_v52 = vld [vmem:[#allocation2 + $0xf0] sm:$0xff] }
0x1dc9   :  { %4208 = vmatprep.subr.mxu0 %v5004_v53 }
0x1dca   :  { %4209 = vmatpush3.msra.mxu0 %v5004_v53 }
0x1dcb   :  { %4210 = vmatprep.subr.mxu0 %v5011_v54 }
0x1dcc   :  { %4211 = vmatpush3.msra.mxu0 %v5011_v54 }
0x1dcd   :  { %4212 = vmatprep.subr.mxu0 %v5018_v57 }
0x1dce   :  { %4213 = vmatpush3.msra.mxu0 %v5018_v57 }
0x1dcf   :  { %4214 = vmatprep.subr.mxu0 %v5025_v62 }
0x1dd0   :  { %4215 = vmatpush3.msra.mxu0 %v5025_v62 }
0x1dd1   :  { %4216 = vmatprep.subr.mxu0 %v5032_v3 }
0x1dd2   :  { %4217 = vmatpush3.msra.mxu0 %v5032_v3 }
0x1e83   :  { %v4201_v49 = vpop.f32.mrf.mxu0 }
0x1e85   :  { %v3107_v50 = vpop.f32.mrf.mxu0 }
0x1e86   :  { %4218 = vmatprep.mubr.msk.f32.mxu0 %vm462_vm2, %v3107_v50 }
0x1e87   :  { %4219 = vmatmul.mubr.msk.f32.vlgmr.msra.gmra.mxu0 %vm462_vm2, %v4201_v49 }
0x1f47   :  { %v4220_v53 = vpop.f32.mrf.mxu0 }
0x1f48   :  { %v3198_v54 = vadd.f32 %v4220_v53, %v3031_v52 }
0x1f49   :  { %v3188_v6 = vpop.f32.mrf.mxu0 }
0x1f4a   :  { %v3593_v57 = vmul.f32 -1.442695, %v3198_v54  ;;  %v3197_v7 = vadd.f32 %v3188_v6, %v3029_v4 }
0x1f4c   :  { %4353 = vpow2.f32 %v3593_v57  ;;  %v3592_v9 = vmul.f32 -1.442695, %v3197_v7 }
0x1f4e   :  { %4355 = vpow2.f32 %v3592_v9 }
0x1f59   :  { %v4354_v62 = vpop.eup %4353 }
0x1f5a   :  { %v3206_v10 = vadd.f32 1.0, %v4354_v62 }
0x1f5b   :  { %v4356_v34 = vpop.eup %4355 }
0x1f5c   :  { %4357 = vrcp.f32 %v3206_v10  ;;  %v3205_v3 = vadd.f32 1.0, %v4356_v34 }
0x1f5e   :  { %4359 = vrcp.f32 %v3205_v3 }
0x1f69   :  { %v5313_v12 = vpop.eup %4357 }
0x1f6a   :  { %v3212_v38 = vmul.f32 %v5313_v12, %v3038_v14  ;;  %v3376_v35 = vsub.f32 1.0, %v5313_v12  ;;  %v3374_v37 = vmul.f32 %v5313_v12, %v5284_v60 }
0x1f6b   :  { %v5316_v13 = vpop.eup %4359 }
0x1f6c   :  { %4221 = vmatprep.subr.mxu1 %v3212_v38  ;;  %v3211_v15 = vmul.f32 %v5316_v13, %v3036_v2  ;;  %v3375_v8 = vsub.f32 1.0, %v5316_v13  ;;  %v3373_v42 = vmul.f32 %v5316_v13, %v5287_v11 }
0x1f6d   :  { %4222 = vmatpush3.msra.mxu1 %v3212_v38 }
0x1f6e   :  { %4223 = vmatprep.subr.mxu1 %v3211_v15 }
0x1f6f   :  { %4224 = vmatpush3.msra.mxu1 %v3211_v15 }
0x1f70   :  { %4226 = vmatmul.mubr.msk.f32.vlgmr.msra.gmra.mxu1 %vm516_vm1, %v4976_v41  ;;  %4228 = vmatprep.subr.mxu1 %v5110_v43 }
0x1f71   :  { %4229 = vmatpush3.msra.mxu1 %v5110_v43 }
0x1f72   :  { %4230 = vmatprep.subr.mxu1 %v5117_v47 }
0x1f73   :  { %4231 = vmatpush3.msra.mxu1 %v5117_v47  ;;  %v3032_v47 = vld [vmem:[#allocation2 + $0xf8] sm:$0xff] }
0x1f74   :  { %4232 = vmatprep.subr.mxu1 %v5124_v23 }
0x1f75   :  { %4233 = vmatpush3.msra.mxu1 %v5124_v23 }
0x1f76   :  { %4234 = vmatprep.subr.mxu1 %v5131_v24 }
0x1f77   :  { %4235 = vmatpush3.msra.mxu1 %v5131_v24 }
0x1f78   :  { %4236 = vmatprep.subr.mxu1 %v5138_v25 }
0x1f79   :  { %4237 = vmatpush3.msra.mxu1 %v5138_v25  ;;  %v3030_v25 = vld [vmem:[#allocation2 + $0xe8] sm:$0xff] }
0x1f7a   :  { %4238 = vmatprep.subr.mxu1 %v5145_v26 }
0x1f7b   :  { %4239 = vmatpush3.msra.mxu1 %v5145_v26 }
0x1f7c   :  { %4240 = vmatprep.subr.mxu1 %v5152_v27 }
0x1f7d   :  { %4241 = vmatpush3.msra.mxu1 %v5152_v27  ;;  %v3396_v27 = vld [vmem:[%s5388_s7 + $0x38] sm:$0xff] }
0x1f7e   :  { %4242 = vmatprep.subr.mxu1 %v5159_v1  ;;  %4247 = vmatprep.subr.mxu0 %v3396_v27 }
0x1f7f   :  { %4243 = vmatpush3.msra.mxu1 %v5159_v1  ;;  %v3395_v1 = vld [vmem:[%s5388_s7 + $0x30] sm:$0xff]  ;;  %4248 = vmatpush3.msra.mxu0 %v3396_v27 }
0x1f80   :  { %4249 = vmatprep.subr.mxu0 %v3395_v1 }
0x1f81   :  { %4250 = vmatpush3.msra.mxu0 %v3395_v1 }
0x1f82   :  { %4251 = vmatprep.subr.mxu0 %v3394_v20 }
0x1f83   :  { %4252 = vmatpush3.msra.mxu0 %v3394_v20 }
0x1f84   :  { %4253 = vmatprep.subr.mxu0 %v3393_v16 }
0x1f85   :  { %4254 = vmatpush3.msra.mxu0 %v3393_v16 }
0x1f86   :  { %4255 = vmatprep.subr.mxu0 %v3392_v18 }
0x1f87   :  { %4256 = vmatpush3.msra.mxu0 %v3392_v18 }
0x1f88   :  { %4257 = vmatprep.subr.mxu0 %v3391_v31 }
0x1f89   :  { %4258 = vmatpush3.msra.mxu0 %v3391_v31 }
0x1f8a   :  { %4259 = vmatprep.subr.mxu0 %v3390_v32 }
0x1f8b   :  { %4260 = vmatpush3.msra.mxu0 %v3390_v32 }
0x1f8c   :  { %4261 = vmatprep.subr.mxu0 %v3389_v33 }
0x1f8d   :  { %4262 = vmatpush3.msra.mxu0 %v3389_v33 }
0x2030   :  { %v4227_v41 = vpop.f32.mrf.mxu1 }
0x2032   :  { %v3279_v43 = vpop.f32.mrf.mxu1 }
0x2033   :  { %4244 = vmatprep.mubr.msk.f32.mxu1 %vm462_vm2, %v3279_v43 }
0x2034   :  { %4245 = vmatmul.mubr.msk.f32.vlgmr.msra.gmra.mxu1 %vm462_vm2, %v4227_v41 }
0x20f4   :  { %v4246_v23 = vpop.f32.mrf.mxu1 }
0x20f5   :  { %v3370_v24 = vadd.f32 %v4246_v23, %v3032_v47 }
0x20f6   :  { %v3360_v17 = vpop.f32.mrf.mxu1 }
0x20f7   :  { %4361 = vtanh.f32 %v3370_v24  ;;  %v3369_v26 = vadd.f32 %v3360_v17, %v3030_v25 }
0x20f9   :  { %4363 = vtanh.f32 %v3369_v26 }
0x2104   :  { %v4362_v30 = vpop.eup %4361 }
0x2105   :  { %3381 = vrot.lane.b32.xlu1 %v4362_v30, %s4407_s1 }
0x2106   :  { %v4364_v29 = vpop.eup %4363 }
0x2107   :  { %3379 = vrot.lane.b32.xlu0 %v4364_v29, %s4407_s1 }
0x2177   :  { %v3382_v36 = vpop.permute.xlu1 %3381 }
0x2178   :  { %v3386_v63 = vmul.f32 %v3382_v36, %v3376_v35 }
0x2179   :  { %v3380_v39 = vpop.permute.xlu0 %3379 }
0x217a   :  { %v3388_v19 = vadd.f32 %v3386_v63, %v3374_v37  ;;  %v3385_v0 = vmul.f32 %v3380_v39, %v3375_v8 }
0x217c   :  { %v3387_v44 = vadd.f32 %v3385_v0, %v3373_v42  ;;  %3401 = vrot.lane.b32.xlu1 %v3388_v19, %s4407_s1 }
0x217e   :  { %3399 = vrot.lane.b32.xlu0 %v3387_v44, %s4407_s1 }
0x21ee   :  { %v3402_v46 = vpop.permute.xlu1 %3401 }
0x21f0   :  { %v3400_v45 = vpop.permute.xlu0 %3399 }
0x21f1   :  { %4263 = vmatprep.mubr.msk.f32.mxu0 %vm462_vm2, %v3400_v45 }
0x21f2   :  { %4264 = vmatmul.mubr.msk.f32.vlgmr.msra.gmra.mxu0 %vm462_vm2, %v3402_v46 }
0x22b2   :  { %v4265_v51 = vpop.f32.mrf.mxu0 }
0x22b3   :  { %v3484_v40 = vsel %vm3482_vm3, %v4265_v51, 0.0 }
0x22b4   :  { %v3473_v55 = vpop.f32.mrf.mxu0 }
0x22b5   :  { %v3483_v48 = vsel %vm3482_vm3, %v3473_v55, 0.0 }
0x22b6   :  { %v3485_v59 = vadd.f32 %v3484_v40, %v3483_v48 }
0x22b8   :  { %v3486_v58 = vrot.slane %v3485_v59, 4 }
0x22ba   :  { %v3487_v21 = vadd.f32 %v3486_v58, %v3485_v59 }
0x22bc   :  { %v3488_v22 = vrot.slane %v3487_v21, 2 }
0x22be   :  { %v3489_v56 = vadd.f32 %v3488_v22, %v3487_v21 }
0x22c0   :  { %v3490_v28 = vrot.slane %v3489_v56, 1 }
0x22c2   :  { %v3491_v60 = vadd.f32 %v3490_v28, %v3489_v56 }
0x22c4   :  { %v3492_v5 = vmul.f32 0.0625, %v3491_v60 }
0x22c6   :  { %v3494_v11 = vadd.f32 %v3493_v61, %v3492_v5 }
0x22c8   :  { %3496 = vst.msk [vmem:[%s5390_s9] sm:$0x1] %vm3495_vm4, %v3494_v11 }
0x22c9   :  { %3501 = vsyncpa [#allocation4], 1 }

</bundles_post_ra>
